<compile_context>
chip_gen: v5e
topology: v5e:2x2
jax: 0.10.0
libtpu: 0.0.40
codegen_flags: <defaults>
</compile_context>

<pallas_src>
import functools

import jax
import jax.numpy as jnp
from jax.experimental import pallas as pl
from jax.experimental.pallas import tpu as pltpu


def _defunc_kernel(y_ref, w1_ref, b1_ref, w2_ref, b2_ref, out_ref, *,
                   order, size_order):
    y = y_ref[...]                                        # (TILE_B, D) f32

    # net(y): MLP hot path. bf16 operands on the MXU, f32 accumulation,
    # f32 VPU/EUP math for bias + tanh (v5e has no bf16 VPU/EUP path).
    h = jnp.tanh(
        jnp.dot(y.astype(jnp.bfloat16), w1_ref[...],
                preferred_element_type=jnp.float32)
        + b1_ref[...]
    )                                                     # (TILE_B, H) f32
    f = (jnp.dot(h.astype(jnp.bfloat16), w2_ref[...],
                 preferred_element_type=jnp.float32)
         + b2_ref[...])                                   # (TILE_B, D//order) f32

    if order > 1:
        # high_order_forward: out = cat([y[..., s:], net(y)], -1)
        # Build the full tile and store once (lane-dense when size_order
        # is a multiple of 128, which the wrapper/test arranges).
        out = jnp.concatenate([y[:, size_order:], f], axis=-1)
    else:
        out = f
    out_ref[...] = out.astype(out_ref.dtype)


def defunc_forward(s, y, params, *, order, tile_b=256):
    """Pallas implementation of defunc.forward(s, y).

    `s` (the time scalar) is accepted for API parity but unused: the wrapped
    net is autonomous (only takes y), exactly as in the reference module.
    """
    del s  # unused by the net, matching `self.net(y)`
    w1, b1, w2, b2 = params
    B, D = y.shape
    assert D % order == 0, "feature dim must be divisible by `order`"
    size_order = D // order
    H = w1.shape[1]
    d_out = w2.shape[1]
    out_d = D if order > 1 else d_out

    tile_b = min(tile_b, B)
    assert B % tile_b == 0, "batch must be divisible by the batch tile"
    grid = (B // tile_b,)

    kernel = functools.partial(_defunc_kernel, order=order,
                               size_order=size_order)

    out = pl.pallas_call(
        kernel,
        out_shape=jax.ShapeDtypeStruct((B, out_d), y.dtype),
        grid_spec=pltpu.PrefetchScalarGridSpec(
            num_scalar_prefetch=0,
            grid=grid,
            in_specs=[
                # y: batch-tiled, pipelined / double-buffered.
                pl.BlockSpec((tile_b, D), lambda i: (i, 0)),
                # weights & biases: VMEM-resident across the whole grid.
                pl.BlockSpec((D, H), lambda i: (0, 0)),
                pl.BlockSpec((1, H), lambda i: (0, 0)),
                pl.BlockSpec((H, d_out), lambda i: (0, 0)),
                pl.BlockSpec((1, d_out), lambda i: (0, 0)),
            ],
            out_specs=pl.BlockSpec((tile_b, out_d), lambda i: (i, 0)),
        ),
        compiler_params=pltpu.CompilerParams(
            # Batch tiles are independent -> shard across v7x's 2 TCs.
            dimension_semantics=("parallel",),
            # Above the 16/32 MiB scoped defaults, below physical on all gens.
            vmem_limit_bytes=48 * 1024 * 1024,
        ),
    )(y, w1, b1, w2, b2)
    return out


def make_net_params(key, d_in, hidden, d_out):
    """Weights stored bf16 (MXU operands), biases f32 (VPU math)."""
    k1, k2, k3, k4 = jax.random.split(key, 4)
    w1 = (jax.random.normal(k1, (d_in, hidden), jnp.float32) * 0.1
          ).astype(jnp.bfloat16)
    b1 = jax.random.normal(k2, (1, hidden), jnp.float32) * 0.01
    w2 = (jax.random.normal(k3, (hidden, d_out), jnp.float32) * 0.1
          ).astype(jnp.bfloat16)
    b2 = jax.random.normal(k4, (1, d_out), jnp.float32) * 0.01
    return (w1, b1, w2, b2)


def _net_ref(y, p):
    """Pure-JAX reference with the same bf16-operand / f32-accumulate recipe."""
    w1, b1, w2, b2 = p
    h = jnp.tanh(jnp.dot(y.astype(jnp.bfloat16), w1,
                         preferred_element_type=jnp.float32) + b1)
    return jnp.dot(h.astype(jnp.bfloat16), w2,
                   preferred_element_type=jnp.float32) + b2


if __name__ == "__main__":
    key = jax.random.PRNGKey(0)
    ky, kp1, kp2 = jax.random.split(key, 3)

    # Lane-aligned, MXU-friendly (but still small) shapes:
    #   D = H = 256 (multiple of 128), size_order = 128, TILE_B = 256.
    B = 512
    ORDER = 2
    SIZE_ORDER = 128
    D = ORDER * SIZE_ORDER        # 256
    H = 256
    TILE_B = 256

    y = jax.random.normal(ky, (B, D), jnp.float32)
    s = jnp.float32(0.5)          # time scalar (unused by the autonomous net)

    # --- order > 1 path (high_order_forward) ---
    params_ho = make_net_params(kp1, D, H, D // ORDER)
    out_ho = defunc_forward(s, y, params_ho, order=ORDER, tile_b=TILE_B)
    out_ho = jax.block_until_ready(out_ho)
    assert out_ho.shape == (B, D)

    # --- order == 1 path (plain net(y)) ---
    params_o1 = make_net_params(kp2, D, H, D)
    out_o1 = defunc_forward(s, y, params_o1, order=1, tile_b=TILE_B)
    out_o1 = jax.block_until_ready(out_o1)
    assert out_o1.shape == (B, D)

    # Correctness check against pure-JAX reference (same precision recipe).
    ref_ho = jnp.concatenate([y[:, SIZE_ORDER:], _net_ref(y, params_ho)],
                             axis=-1)
    ref_o1 = _net_ref(y, params_o1)
    assert jnp.allclose(out_ho, ref_ho, atol=1e-2, rtol=1e-2)
    assert jnp.allclose(out_o1, ref_o1, atol=1e-2, rtol=1e-2)

    print("KERNEL_OK")
</pallas_src>

<mosaic_0001>
module attributes {stable_mosaic.version = 11 : i64} {
  func.func @_defunc_kernel(%arg0: i32, %arg1: memref<256x256xf32, #tpu.memory_space<vmem>>, %arg2: memref<256x256xbf16, #tpu.memory_space<vmem>>, %arg3: memref<1x256xf32, #tpu.memory_space<vmem>>, %arg4: memref<256x128xbf16, #tpu.memory_space<vmem>>, %arg5: memref<1x128xf32, #tpu.memory_space<vmem>>, %arg6: memref<256x256xf32, #tpu.memory_space<vmem>>) attributes {dimension_semantics = [#tpu.dimension_semantics<parallel>], iteration_bounds = array<i64: 2>, scalar_prefetch = 0 : i64, scratch_operands = 0 : i64, tpu.core_type = #tpu.core_type<tc>, window_params = [{transform_indices = @transform_0, window_bounds = array<i64: 256, 256>}, {pipeline_mode = #tpu.pipeline_mode<synchronous>, transform_indices = @transform_1, window_bounds = array<i64: 256, 256>}, {pipeline_mode = #tpu.pipeline_mode<synchronous>, transform_indices = @transform_2, window_bounds = array<i64: 1, 256>}, {pipeline_mode = #tpu.pipeline_mode<synchronous>, transform_indices = @transform_3, window_bounds = array<i64: 256, 128>}, {pipeline_mode = #tpu.pipeline_mode<synchronous>, transform_indices = @transform_4, window_bounds = array<i64: 1, 128>}, {transform_indices = @transform_5, window_bounds = array<i64: 256, 256>}]} {
    %c0 = arith.constant 0 : index
    %c0_0 = arith.constant 0 : index
    %0 = vector.load %arg1[%c0, %c0_0] : memref<256x256xf32, #tpu.memory_space<vmem>>, vector<256x256xf32>
    %1 = arith.truncf %0 : vector<256x256xf32> to vector<256x256xbf16>
    %c0_1 = arith.constant 0 : index
    %c0_2 = arith.constant 0 : index
    %2 = vector.load %arg2[%c0_1, %c0_2] : memref<256x256xbf16, #tpu.memory_space<vmem>>, vector<256x256xbf16>
    %cst = arith.constant dense<0.000000e+00> : vector<256x256xf32>
    %3 = tpu.matmul %1, %2, %cst {dimension_numbers = #tpu.dot_dimension_numbers<[1], [0], [0], [1], [0, 0, 1, 1], [], []>} : vector<256x256xbf16>, vector<256x256xbf16>, vector<256x256xf32> -> vector<256x256xf32>
    %c0_3 = arith.constant 0 : index
    %c0_4 = arith.constant 0 : index
    %4 = vector.load %arg3[%c0_3, %c0_4] : memref<1x256xf32, #tpu.memory_space<vmem>>, vector<1x256xf32>
    %5 = vector.broadcast %4 : vector<1x256xf32> to vector<256x256xf32>
    %6 = arith.addf %3, %5 : vector<256x256xf32>
    %7 = math.tanh %6 : vector<256x256xf32>
    %8 = arith.truncf %7 : vector<256x256xf32> to vector<256x256xbf16>
    %c0_5 = arith.constant 0 : index
    %c0_6 = arith.constant 0 : index
    %9 = vector.load %arg4[%c0_5, %c0_6] : memref<256x128xbf16, #tpu.memory_space<vmem>>, vector<256x128xbf16>
    %cst_7 = arith.constant dense<0.000000e+00> : vector<256x128xf32>
    %10 = tpu.matmul %8, %9, %cst_7 {dimension_numbers = #tpu.dot_dimension_numbers<[1], [0], [0], [1], [0, 0, 1, 1], [], []>} : vector<256x256xbf16>, vector<256x128xbf16>, vector<256x128xf32> -> vector<256x128xf32>
    %c0_8 = arith.constant 0 : index
    %c0_9 = arith.constant 0 : index
    %11 = vector.load %arg5[%c0_8, %c0_9] : memref<1x128xf32, #tpu.memory_space<vmem>>, vector<1x128xf32>
    %12 = vector.broadcast %11 : vector<1x128xf32> to vector<256x128xf32>
    %13 = arith.addf %10, %12 : vector<256x128xf32>
    %14 = vector.extract_strided_slice %0 {offsets = [0, 128], sizes = [256, 128], strides = [1, 1]} : vector<256x256xf32> to vector<256x128xf32>
    %15 = tpu.concatenate %14, %13 in 1 : vector<256x128xf32>, vector<256x128xf32> -> vector<256x256xf32>
    %c0_10 = arith.constant 0 : index
    %c0_11 = arith.constant 0 : index
    %16 = vector.load %arg6[%c0_10, %c0_11] : memref<256x256xf32, #tpu.memory_space<vmem>>, vector<256x256xf32>
    tpu.vector_store %arg6[%c0_10, %c0_11], %15 {strides = array<i32>} : memref<256x256xf32, #tpu.memory_space<vmem>>, vector<256x256xf32>,
    return
  }
  func.func @transform_0(%arg0: i32) -> (i32, i32) {
    %c0_i32 = arith.constant 0 : i32
    %c0_i32_0 = arith.constant 0 : i32
    return %arg0, %c0_i32 : i32, i32
  }
  func.func @transform_1(%arg0: i32) -> (i32, i32) {
    %c0_i32 = arith.constant 0 : i32
    %c0_i32_0 = arith.constant 0 : i32
    %c0_i32_1 = arith.constant 0 : i32
    return %c0_i32, %c0_i32_0 : i32, i32
  }
  func.func @transform_2(%arg0: i32) -> (i32, i32) {
    %c0_i32 = arith.constant 0 : i32
    %c0_i32_0 = arith.constant 0 : i32
    %c0_i32_1 = arith.constant 0 : i32
    return %c0_i32, %c0_i32_0 : i32, i32
  }
  func.func @transform_3(%arg0: i32) -> (i32, i32) {
    %c0_i32 = arith.constant 0 : i32
    %c0_i32_0 = arith.constant 0 : i32
    %c0_i32_1 = arith.constant 0 : i32
    return %c0_i32, %c0_i32_0 : i32, i32
  }
  func.func @transform_4(%arg0: i32) -> (i32, i32) {
    %c0_i32 = arith.constant 0 : i32
    %c0_i32_0 = arith.constant 0 : i32
    %c0_i32_1 = arith.constant 0 : i32
    return %c0_i32, %c0_i32_0 : i32, i32
  }
  func.func @transform_5(%arg0: i32) -> (i32, i32) {
    %c0_i32 = arith.constant 0 : i32
    %c0_i32_0 = arith.constant 0 : i32
    return %arg0, %c0_i32 : i32, i32
  }
}

</mosaic_0001>

<bundles_post_ra>
// kernel: tpu_custom_call.1
= control target key start
LH: loop header
LB: loop body
LE: loop exit
PB: predicated region body
PF: predicated region fallthrough
CT: control target
= control target key end

     0   :  { %10 = vsyncpa [#allocation3], 0  ;;  %s2942_s0 = inlined_call_operand.hbm [shape: f32[512,256], index: 0, kind: input, shape index: {}]   ;;  %s2943_s1 = inlined_call_operand.hbm [shape: bf16[256,256], index: 1, kind: input, shape index: {}]   ;;  %s2944_s2 = inlined_call_operand.hbm [shape: f32[1,256], index: 2, kind: input, shape index: {}]   ;;  %s2945_s3 = inlined_call_operand.hbm [shape: bf16[256,128], index: 3, kind: input, shape index: {}]   ;;  %s2946_s4 = inlined_call_operand.vmem [shape: f32[1,128], index: 4, kind: input, shape index: {}]   ;;  %s2947_s5 = inlined_call_operand.hbm [shape: f32[512,256], index: 5, kind: output, shape index: {}]  }
   0x1   :  { %12 = vsyncpa [#allocation3 + $0x1], 0 }
   0x2   :  { %13 = vsyncpa [#allocation6], 0 }
   0x3   :  { %14 = vsyncpa [#allocation9], 0 }
   0x4   :  { %15 = vsyncpa [#allocation4], 0 }
   0x5   :  { %17 = vsyncpa [#allocation4 + $0x1], 0  ;;  %s2268_s18 = smov 0   ;;  %s2270_s19 = smov 0  }
   0x6   :  { %s2272_s20 = smov 0   ;;  %s2274_s21 = smov 0  }
   0x7 LB: > { %s2289_s22 = sadd.s32 4294967295, %s2225_s21   ;;  %s1535_s23 = sadd.s32 4294967294, %s2225_s21   ;;  %s2225_s21 = sphi %s2274_s21, %s2958_s21   ;;  %s2221_s20 = sphi %s2272_s20, %s2957_s20   ;;  %s2217_s19 = sphi %s2270_s19, %s2956_s19   ;;  %s2213_s18 = sphi %s2268_s18, %s2955_s18  }
   0x8   : > { %p43_p0 = scmp.ne.s32.totalorder %s2217_s19, %s2213_s18  ;;  %p44_p1 = scmp.eq.s32.totalorder %s2289_s22, 0 }
   0x9   : > { %p151_p2 = scmp.eq.s32.totalorder %s2289_s22, 1  ;;  %p157_p3 = scmp.eq.s32.totalorder %s1535_s23, 1 }
   0xa   : > { %p2298_p4 = por %p44_p1, %p43_p0  ;;  %p1536_p5 = scmp.ge.s32.totalorder %s2225_s21, 1 }
   0xb   : > { %p2303_p6 = por %p157_p3, %p43_p0  ;;  %p164_p7 = scmp.lt.s32.totalorder %s2225_s21, 3 }
   0xc   : > { %s175_s28 = sshll.u32 %s2943_s1, 4  ;;  %s2227_s30 = smov [#allocation5]   ;;  %s176_s28 = int_to_ptr.hbm [resolvable:$true] %s175_s28 }
   0xd   : > { %p2311_p8 = pnand %p1536_p5, %p164_p7  ;;  %s177_s6 = sshll.u32 %s2227_s30, 4  ;;  %s178_s6 = int_to_ptr.vmem [resolvable:$true] %s177_s6 }
   0xe   : > { %s190_s10 = sshll.u32 %s2944_s2, 4  ;;  %s2228_s11 = smov 128   ;;  %s191_s10 = int_to_ptr.hbm [resolvable:$true] %s190_s10 }
   0xf   : > { %p1833_p9 = pneg %p2311_p8  ;;  %s2229_s12 = smov 8  }
  0x10   : > { %s2230_s13 = smov [#allocation7]   ;;  %s201_s17 = sshll.u32 %s2945_s3, 4  ;;  %s202_s17 = int_to_ptr.hbm [resolvable:$true] %s201_s17 }
  0x11   : > { %p2319_p10 = pnand %p1833_p9, %p44_p1  ;;  %s192_s14 = sshll.u32 %s2230_s13, 4  ;;  %s193_s14 = int_to_ptr.vmem [resolvable:$true] %s192_s14 }
  0x12   : > { %s2231_s23 = smov [#allocation8]   ;;  %s2232_s27 = smov 64  }
  0x13   : > { %1836 = dma.hbm_to_vmem [thread:$0]  (!%p2319_p10), %s176_s28, 4096, %s178_s6, [#allocation6], %s2228_s11, %s2228_s11, %s2229_s12  }
  0x14   : > { %1839 = dma.hbm_to_vmem [thread:$0]  (!%p2319_p10), %s191_s10, 32, %s193_s14, [#allocation6]  }
  0x15   : > { %s203_s26 = sshll.u32 %s2231_s23, 4  ;;  %s2233_s28 = smov 4   ;;  %s204_s26 = int_to_ptr.vmem [resolvable:$true] %s203_s26 }
  0x16   : > { %1842 = dma.hbm_to_vmem [thread:$0]  (!%p2319_p10), %s202_s17, 2048, %s204_s26, [#allocation9], %s2232_s27, %s2232_s27, %s2233_s28  }
  0x17   : > { %s2337_s30 = sadd.s32 1, %s2225_s21   ;;  %s30_s8 = sadd.s32 1, %s2221_s20 }
  0x18   : > { %s27_s6 = ssub.s32 %s2225_s21, %s2337_s30  ;;  %p37_p13 = scmp.ne.s32.totalorder %s2221_s20, %s2217_s19 }
  0x19   : > { %p28_p12 = scmp.eq.s32.totalorder %s27_s6, 0  ;;  %p38_p0 = scmp.eq.s32.totalorder %s2225_s21, 0 }
  0x1a   : > { %p1854_p3 = scmp.lt.s32.totalorder %s2225_s21, 2  ;;  %p2351_p7 = por %p151_p2, %p37_p13 }
  0x1b   : > { %s2347_s9 = scalar_select %p28_p12, %s2221_s20, %s30_s8  }
  0x1c   : > { %p39_p5 = por %p38_p0, %p37_p13  ;;  %s220_s7 = sand.u32 1, %s2221_s20  }
  0x1d   : > { %s1750_s11 = sshll.u32 %s2225_s21, 9  ;;  %s1541_s12 = sshll.u32 %s220_s7, 9 }
  0x1e   : > { %s230_s15 = scalar_lea.hbm %s2942_s0, %s1750_s11  ;;  %s224_s17 = scalar_lea.vmem [#allocation2], %s1541_s12 }
  0x1f   : > { %s231_s16 = sshll.u32 %s230_s15, 4  ;;  %s233_s23 = sshll.u32 %s224_s17, 4  ;;  %s232_s16 = int_to_ptr.hbm [resolvable:$true] %s231_s16  ;;  %s234_s23 = int_to_ptr.vmem [resolvable:$true] %s233_s23 }
  0x20   : > { %p2362_p9 = pnand %p1854_p3, %p39_p5  ;;  %s221_s27 = scalar_lea.sflag [#allocation3], %s220_s7 }
  0x21   : > { %s2121_s28 = sshra.s32 %s232_s16, 4  ;;  %s2128_s12 = scalar_lea.hbm %s2942_s0, 1024  ;;  %s2122_s28 = int_to_ptr.hbm [resolvable:$true] %s2121_s28 }
  0x22   : > { %s2123_s6 = scalar_lea.hbm %s2122_s28, 512  ;;  %p2125_p10 = pneg %p2362_p9 }
  0x23   : > { %p2124_p2 = scmp.ne.s32.totalorder %s2122_s28, %s2123_s6  ;;  %p2129_p0 = scmp.lt.s32.totalorder %s2122_s28, %s2942_s0 }
  0x24   : > { %p2130_p3 = scmp.lt.s32.totalorder %s2128_s12, %s2123_s6 }
  0x25   : > { %p2126_p12 = pnand %p2125_p10, %p2124_p2 }
  0x26   : > { %p2131_p5 = por %p2130_p3, %p2129_p0 }
  0x27   : > { %p2127_p13 = pneg %p2126_p12 }
  0x29   : > { %p2132_p11 = pnand %p2131_p5, %p2127_p13 }
  0x2b   : > { %2135 = shalt.err (!%p2132_p11)
}
  0x2c   : > { %s2234_s7 = smov 256   ;;  %s2235_s15 = smov 16  }
  0x2d   : > { %1846 = dma.hbm_to_vmem [thread:$0]  (!%p2362_p9), %s232_s16, 8192, %s234_s23, %s221_s27, %s2234_s7, %s2234_s7, %s2235_s15  }
  0x2e   : > { %245 = sbr.rel (%p2311_p8) target bundleno = 751 (0x2ef), region = 40  ;;  %s2379_s17 = sand.u32 (!%p2311_p8), 1, %s2217_s19  }
  0x2f   : > { %s1546_s28 = sshll.u32 (!%p2311_p8), %s2379_s17, 9  ;;  %s248_s6 = scalar_lea.sflag (!%p2311_p8), [#allocation3], %s2379_s17 }
  0x30   : > { %s2385_s8 = scalar_lea.vmem (!%p2311_p8), [#allocation2], %s1546_s28 }
  0x33   : > { %2196 = dma.done.wait (%p2298_p4), %s248_s6, 8192  }
  0x34   : > { %2198 = vsyncadd (%p2298_p4), %s248_s6, 4294959104 }
  0x35   : > { %2200 = dma.done.wait (%p44_p1), [#allocation6], 4128  }
  0x36   : > { %2202 = vsyncadd (%p44_p1), [#allocation6], 4294963168 }
  0x37   : > { %2204 = dma.done.wait (%p44_p1), [#allocation9], 2048  }
  0x38   : > { %2206 = vsyncadd (%p44_p1), [#allocation9], 4294965248  ;;  %v1609_v0 = vld [vmem:[#allocation5 + $0x70] sm:$0xf]  ;;  %v1766_v1 = vld [vmem:[#allocation5 + $0x74] sm:$0xf0] }
  0x39   : > { %v1673_v2 = vld [vmem:[#allocation5 + $0xf0] sm:$0xf]  ;;  %v1610_v3 = vor.u32 %v1766_v1, %v1609_v0  ;;  %v1782_v4 = vld [vmem:[#allocation5 + $0xf4] sm:$0xf0]  ;;  %v1601_v5 = vld [vmem:[#allocation5 + $0x60] sm:$0xf] }
  0x3a   : > { %v1764_v6 = vld [vmem:[#allocation5 + $0x64] sm:$0xf0]  ;;  %v1674_v7 = vor.u32 %v1782_v4, %v1673_v2  ;;  %v1665_v8 = vld [vmem:[#allocation5 + $0xe0] sm:$0xf]  ;;  %v1593_v12 = vld [vmem:[#allocation5 + $0x50] sm:$0xf] }
  0x3b   : > { %v1780_v9 = vld [vmem:[#allocation5 + $0xe4] sm:$0xf0]  ;;  %590 = vmatpush.bf16.msra.mxu0 %v1610_v3  ;;  %1801 = vmatpush.bf16.msra.mxu2 %v1610_v3  ;;  %v1602_v10 = vor.u32 %v1764_v6, %v1601_v5  ;;  %v1762_v13 = vld [vmem:[#allocation5 + $0x54] sm:$0xf0]  ;;  %v1657_v14 = vld [vmem:[#allocation5 + $0xd0] sm:$0xf] }
  0x3c   : > { %1809 = vmatpush.bf16.msra.mxu3 %v1674_v7  ;;  %679 = vmatpush.bf16.msra.mxu1 %v1674_v7  ;;  %v1666_v11 = vor.u32 %v1780_v9, %v1665_v8  ;;  %v1778_v15 = vld [vmem:[#allocation5 + $0xd4] sm:$0xf0]  ;;  %v1594_v16 = vor.u32 %v1762_v13, %v1593_v12  ;;  %v1585_v18 = vld [vmem:[#allocation5 + $0x40] sm:$0xf]  ;;  %v1760_v19 = vld [vmem:[#allocation5 + $0x44] sm:$0xf0] }
  0x3d   : > { %v1658_v17 = vor.u32 %v1778_v15, %v1657_v14  ;;  %v1649_v20 = vld [vmem:[#allocation5 + $0xc0] sm:$0xf]  ;;  %v1776_v21 = vld [vmem:[#allocation5 + $0xc4] sm:$0xf0]  ;;  %v1586_v22 = vor.u32 %v1760_v19, %v1585_v18  ;;  %v1577_v24 = vld [vmem:[#allocation5 + $0x30] sm:$0xf] }
  0x3e   : > { %v1650_v23 = vor.u32 %v1776_v21, %v1649_v20  ;;  %v1758_v25 = vld [vmem:[#allocation5 + $0x34] sm:$0xf0]  ;;  %v2400_v26 = vld [vmem:[%s2385_s8 + $0x108] sm:$0xff]  ;;  %v1641_v27 = vld [vmem:[#allocation5 + $0xb0] sm:$0xf]  ;;  %s2407_s24 = scalar_lea.vmem [#allocation10], %s1546_s28 }
  0x3f   : > { %591 = vmatpush.bf16.msra.mxu0 %v1602_v10  ;;  %1802 = vmatpush.bf16.msra.mxu2 %v1602_v10  ;;  %v1774_v28 = vld [vmem:[#allocation5 + $0xb4] sm:$0xf0]  ;;  %1384 = vst [vmem:[%s2407_s24 + $0x100] sm:$0xff] %v2400_v26  ;;  %v2414_v30 = vld [vmem:[%s2385_s8 + $0x8] sm:$0xff]  ;;  %v1578_v31 = vor.u32 %v1758_v25, %v1577_v24  ;;  %v1569_v34 = vld [vmem:[#allocation5 + $0x20] sm:$0xf] }
  0x40   : > { %1810 = vmatpush.bf16.msra.mxu3 %v1666_v11  ;;  %680 = vmatpush.bf16.msra.mxu1 %v1666_v11  ;;  %v2403_v29 = vld [vmem:[%s2385_s8 + $0x118] sm:$0xff]  ;;  %1352 = vst [vmem:[%s2407_s24] sm:$0xff] %v2414_v30  ;;  %v1642_v33 = vor.u32 %v1774_v28, %v1641_v27  ;;  %v1756_v35 = vld [vmem:[#allocation5 + $0x24] sm:$0xf0]  ;;  %v1633_v37 = vld [vmem:[#allocation5 + $0xa0] sm:$0xf]  ;;  %s1800_s23 = sshll.u32 %s2289_s22, 9 }
  0x41   : > { %1386 = vst [vmem:[%s2407_s24 + $0x110] sm:$0xff] %v2403_v29  ;;  %v2417_v32 = vld [vmem:[%s2385_s8 + $0x18] sm:$0xff]  ;;  %v2424_v36 = vld [vmem:[%s2385_s8 + $0x128] sm:$0xff]  ;;  %v1570_v41 = vor.u32 %v1756_v35, %v1569_v34  ;;  %v1561_v44 = vld [vmem:[#allocation5 + $0x10] sm:$0xf]  ;;  %v2453_v8 = vpack.c.bf16 %v2403_v29, %v2400_v26  ;;  %s1429_s11 = scalar_lea.hbm %s2947_s5, %s1800_s23  ;;  %s1430_s12 = sshll.u32 %s2407_s24, 4  ;;  %s1431_s12 = int_to_ptr.vmem [resolvable:$true] %s1430_s12 }
  0x42   : > { %1354 = vst [vmem:[%s2407_s24 + $0x10] sm:$0xff] %v2417_v32  ;;  %v1772_v38 = vld [vmem:[#allocation5 + $0xa4] sm:$0xf0]  ;;  %v2427_v39 = vld [vmem:[%s2385_s8 + $0x138] sm:$0xff]  ;;  %v1625_v46 = vld [vmem:[#allocation5 + $0x90] sm:$0xf]  ;;  %v2457_v9 = vpack.c.bf16 %v2417_v32, %v2414_v30 }
  0x43   : > { %592 = vmatpush.bf16.msra.mxu0 %v1594_v16  ;;  %1803 = vmatpush.bf16.msra.mxu2 %v1594_v16  ;;  %1388 = vst [vmem:[%s2407_s24 + $0x120] sm:$0xff] %v2424_v36  ;;  %v2434_v40 = vld [vmem:[%s2385_s8 + $0x28] sm:$0xff]  ;;  %v2437_v42 = vld [vmem:[%s2385_s8 + $0x38] sm:$0xff]  ;;  %v1634_v43 = vor.u32 %v1772_v38, %v1633_v37  ;;  %v1553_v50 = vld [vmem:[#allocation5] sm:$0xf]  ;;  %v2481_v28 = vpack.c.bf16 %v2427_v39, %v2424_v36  ;;  %s1432_s13 = sshll.u32 %s1429_s11, 4  ;;  %s1433_s13 = int_to_ptr.hbm [resolvable:$true] %s1432_s13 }
  0x44   : > { %1811 = vmatpush.bf16.msra.mxu3 %v1658_v17  ;;  %681 = vmatpush.bf16.msra.mxu1 %v1658_v17  ;;  %1390 = vst [vmem:[%s2407_s24 + $0x130] sm:$0xff] %v2427_v39  ;;  %v1754_v45 = vld [vmem:[#allocation5 + $0x14] sm:$0xf0]  ;;  %v1752_v51 = vld [vmem:[#allocation5 + $0x4] sm:$0xf0]  ;;  %v296_v54 = vld [vmem:[%s2385_s8] sm:$0xff]  ;;  %v2485_v29 = vpack.c.bf16 %v2437_v42, %v2434_v40 }
  0x45   : > { %1356 = vst [vmem:[%s2407_s24 + $0x20] sm:$0xff] %v2434_v40  ;;  %v1770_v47 = vld [vmem:[#allocation5 + $0x94] sm:$0xf0]  ;;  %v1562_v48 = vor.u32 %v1754_v45, %v1561_v44  ;;  %v1617_v52 = vld [vmem:[#allocation5 + $0x80] sm:$0xf]  ;;  %v1554_v59 = vor.u32 %v1752_v51, %v1553_v50  ;;  %v298_v60 = vld [vmem:[%s2385_s8 + $0x10] sm:$0xff] }
  0x46   : > { %1358 = vst [vmem:[%s2407_s24 + $0x30] sm:$0xff] %v2437_v42  ;;  %v1626_v49 = vor.u32 %v1770_v47, %v1625_v46  ;;  %v1768_v53 = vld [vmem:[#allocation5 + $0x84] sm:$0xf0]  ;;  %v1765_v55 = vld [vmem:[#allocation5 + $0x74] sm:$0xf]  ;;  %v328_v61 = vld [vmem:[%s2385_s8 + $0x100] sm:$0xff]  ;;  %v2447_v3 = vpack.c.bf16 %v298_v60, %v296_v54 }
  0x47   : > { %593 = vmatpush.bf16.msra.mxu0 %v1586_v22  ;;  %1804 = vmatpush.bf16.msra.mxu2 %v1586_v22  ;;  %v1611_v56 = vld [vmem:[#allocation5 + $0x78] sm:$0xf0]  ;;  %v1781_v57 = vld [vmem:[#allocation5 + $0xf4] sm:$0xf]  ;;  %v1618_v63 = vor.u32 %v1768_v53, %v1617_v52  ;;  %v1763_v2 = vld [vmem:[#allocation5 + $0x64] sm:$0xf] }
  0x48   : > { %1812 = vmatpush.bf16.msra.mxu3 %v1650_v23  ;;  %682 = vmatpush.bf16.msra.mxu1 %v1650_v23  ;;  %v1675_v58 = vld [vmem:[#allocation5 + $0xf8] sm:$0xf0]  ;;  %v330_v62 = vld [vmem:[%s2385_s8 + $0x110] sm:$0xff]  ;;  %v1614_v0 = vor.u32 %v1765_v55, %v1611_v56  ;;  %v1603_v5 = vld [vmem:[#allocation5 + $0x68] sm:$0xf0]  ;;  %s1417_s14 = scalar_lea.sflag [#allocation4], %s2379_s17 }
  0x49   : > { %v1678_v1 = vor.u32 %v1781_v57, %v1675_v58  ;;  %v2449_v4 = vpack.c.bf16 %v330_v62, %v328_v61  ;;  %v1779_v6 = vld [vmem:[#allocation5 + $0xe4] sm:$0xf]  ;;  %v1667_v7 = vld [vmem:[#allocation5 + $0xe8] sm:$0xf0]  ;;  %v1606_v11 = vor.u32 %v1763_v2, %v1603_v5  ;;  %v339_v13 = vld [vmem:[%s2385_s8 + $0x158] sm:$0xff]  ;;  %s2165_s22 = sshra.s32 %s1433_s13, 4  ;;  %s2166_s22 = int_to_ptr.hbm [resolvable:$true] %s2165_s22 }
  0x4a   : > { %v337_v10 = vld [vmem:[%s2385_s8 + $0x148] sm:$0xff]  ;;  %v1670_v12 = vor.u32 %v1779_v6, %v1667_v7  ;;  %1394 = vst [vmem:[%s2407_s24 + $0x150] sm:$0xff] %v339_v13  ;;  %v1761_v15 = vld [vmem:[#allocation5 + $0x54] sm:$0xf]  ;;  %v1595_v16 = vld [vmem:[#allocation5 + $0x58] sm:$0xf0]  ;;  %p2172_p11 = scmp.lt.s32.totalorder %s2166_s22, %s2947_s5 }
  0x4b   : > { %594 = vmatpush.bf16.msra.mxu0 %v1578_v31  ;;  %1805 = vmatpush.bf16.msra.mxu2 %v1578_v31  ;;  %1392 = vst [vmem:[%s2407_s24 + $0x140] sm:$0xff] %v337_v10  ;;  %v305_v14 = vld [vmem:[%s2385_s8 + $0x48] sm:$0xff]  ;;  %v307_v17 = vld [vmem:[%s2385_s8 + $0x58] sm:$0xff]  ;;  %v1777_v18 = vld [vmem:[#allocation5 + $0xd4] sm:$0xf]  ;;  %v1598_v20 = vor.u32 %v1761_v15, %v1595_v16  ;;  %v2507_v46 = vpack.c.bf16 %v339_v13, %v337_v10  ;;  %s2167_s7 = scalar_lea.hbm %s2166_s22, 512 }
  0x4c   : > { %1813 = vmatpush.bf16.msra.mxu3 %v1642_v33  ;;  %683 = vmatpush.bf16.msra.mxu1 %v1642_v33  ;;  %1360 = vst [vmem:[%s2407_s24 + $0x40] sm:$0xff] %v305_v14  ;;  %v1659_v19 = vld [vmem:[#allocation5 + $0xd8] sm:$0xf0]  ;;  %v300_v22 = vld [vmem:[%s2385_s8 + $0x20] sm:$0xff]  ;;  %v302_v23 = vld [vmem:[%s2385_s8 + $0x30] sm:$0xff]  ;;  %v2509_v47 = vpack.c.bf16 %v307_v17, %v305_v14  ;;  %p2168_p1 = scmp.ne.s32.totalorder %s2166_s22, %s2167_s7  ;;  %s2171_s6 = scalar_lea.hbm %s2947_s5, 1024 }
  0x4d   : > { %1362 = vst [vmem:[%s2407_s24 + $0x50] sm:$0xff] %v307_v17  ;;  %v1662_v21 = vor.u32 %v1777_v18, %v1659_v19  ;;  %v332_v24 = vld [vmem:[%s2385_s8 + $0x120] sm:$0xff]  ;;  %v334_v25 = vld [vmem:[%s2385_s8 + $0x130] sm:$0xff]  ;;  %v2475_v26 = vpack.c.bf16 %v302_v23, %v300_v22  ;;  %v341_v30 = vld [vmem:[%s2385_s8 + $0x168] sm:$0xff]  ;;  %p2173_p9 = scmp.lt.s32.totalorder %s2171_s6, %s2167_s7 }
  0x4e   : > { %v2477_v27 = vpack.c.bf16 %v334_v25, %v332_v24  ;;  %v343_v31 = vld [vmem:[%s2385_s8 + $0x178] sm:$0xff]  ;;  %1396 = vst [vmem:[%s2407_s24 + $0x160] sm:$0xff] %v341_v30  ;;  %v309_v32 = vld [vmem:[%s2385_s8 + $0x68] sm:$0xff]  ;;  %v1759_v33 = vld [vmem:[#allocation5 + $0x44] sm:$0xf]  ;;  %p2169_p4 = pnand %p2168_p1, %p2351_p7 }
  0x4f   : > { %595 = vmatpush.bf16.msra.mxu0 %v1570_v41  ;;  %1806 = vmatpush.bf16.msra.mxu2 %v1570_v41  ;;  %1398 = vst [vmem:[%s2407_s24 + $0x170] sm:$0xff] %v343_v31  ;;  %v1587_v34 = vld [vmem:[#allocation5 + $0x48] sm:$0xf0]  ;;  %v311_v35 = vld [vmem:[%s2385_s8 + $0x78] sm:$0xff]  ;;  %v1775_v37 = vld [vmem:[#allocation5 + $0xc4] sm:$0xf]  ;;  %p2174_p2 = por %p2173_p9, %p2172_p11 }
  0x50   : > { %1814 = vmatpush.bf16.msra.mxu3 %v1634_v43  ;;  %684 = vmatpush.bf16.msra.mxu1 %v1634_v43  ;;  %1364 = vst [vmem:[%s2407_s24 + $0x60] sm:$0xff] %v309_v32  ;;  %v1590_v36 = vor.u32 %v1759_v33, %v1587_v34  ;;  %v1651_v38 = vld [vmem:[#allocation5 + $0xc8] sm:$0xf0]  ;;  %v304_v40 = vld [vmem:[%s2385_s8 + $0x40] sm:$0xff]  ;;  %v306_v41 = vld [vmem:[%s2385_s8 + $0x50] sm:$0xff]  ;;  %p2170_p8 = pneg %p2169_p4 }
  0x51   : > { %1366 = vst [vmem:[%s2407_s24 + $0x70] sm:$0xff] %v311_v35  ;;  %v1654_v39 = vor.u32 %v1775_v37, %v1651_v38  ;;  %v336_v42 = vld [vmem:[%s2385_s8 + $0x140] sm:$0xff]  ;;  %v338_v43 = vld [vmem:[%s2385_s8 + $0x150] sm:$0xff]  ;;  %v2503_v44 = vpack.c.bf16 %v306_v41, %v304_v40  ;;  %v313_v50 = vld [vmem:[%s2385_s8 + $0x88] sm:$0xff] }
  0x52   : > { %v2505_v45 = vpack.c.bf16 %v338_v43, %v336_v42  ;;  %v1757_v51 = vld [vmem:[#allocation5 + $0x34] sm:$0xf]  ;;  %v1579_v52 = vld [vmem:[#allocation5 + $0x38] sm:$0xf0]  ;;  %1368 = vst [vmem:[%s2407_s24 + $0x80] sm:$0xff] %v313_v50  ;;  %v308_v58 = vld [vmem:[%s2385_s8 + $0x60] sm:$0xff]  ;;  %p2175_p10 = pnand %p2174_p2, %p2170_p8 }
  0x53   : > { %596 = vmatpush.bf16.msra.mxu0 %v1562_v48  ;;  %1807 = vmatpush.bf16.msra.mxu2 %v1562_v48  ;;  %v345_v48 = vld [vmem:[%s2385_s8 + $0x188] sm:$0xff]  ;;  %v315_v53 = vld [vmem:[%s2385_s8 + $0x98] sm:$0xff]  ;;  %v1582_v54 = vor.u32 %v1757_v51, %v1579_v52  ;;  %v1773_v55 = vld [vmem:[#allocation5 + $0xb4] sm:$0xf] }
  0x54   : > { %1815 = vmatpush.bf16.msra.mxu3 %v1626_v49  ;;  %685 = vmatpush.bf16.msra.mxu1 %v1626_v49  ;;  %v347_v49 = vld [vmem:[%s2385_s8 + $0x198] sm:$0xff]  ;;  %1400 = vst [vmem:[%s2407_s24 + $0x180] sm:$0xff] %v345_v48  ;;  %v340_v60 = vld [vmem:[%s2385_s8 + $0x160] sm:$0xff]  ;;  %v342_v61 = vld [vmem:[%s2385_s8 + $0x170] sm:$0xff]  ;;  %v2557_v23 = vpack.c.bf16 %v315_v53, %v313_v50 }
  0x55   : > { %1402 = vst [vmem:[%s2407_s24 + $0x190] sm:$0xff] %v347_v49  ;;  %v1643_v56 = vld [vmem:[#allocation5 + $0xb8] sm:$0xf0]  ;;  %v349_v2 = vld [vmem:[%s2385_s8 + $0x1a8] sm:$0xff]  ;;  %v1755_v7 = vld [vmem:[#allocation5 + $0x24] sm:$0xf]  ;;  %v2555_v22 = vpack.c.bf16 %v347_v49, %v345_v48 }
  0x56   : > { %1370 = vst [vmem:[%s2407_s24 + $0x90] sm:$0xff] %v315_v53  ;;  %v1646_v57 = vor.u32 %v1773_v55, %v1643_v56  ;;  %v351_v5 = vld [vmem:[%s2385_s8 + $0x1b8] sm:$0xff]  ;;  %v317_v6 = vld [vmem:[%s2385_s8 + $0xa8] sm:$0xff]  ;;  %v1771_v13 = vld [vmem:[#allocation5 + $0xa4] sm:$0xf] }
  0x57   : > { %597 = vmatpush.bf16.msra.mxu0 %v1554_v59  ;;  %1808 = vmatpush.bf16.msra.mxu2 %v1554_v59  ;;  %v310_v59 = vld [vmem:[%s2385_s8 + $0x70] sm:$0xff]  ;;  %1404 = vst [vmem:[%s2407_s24 + $0x1a0] sm:$0xff] %v349_v2  ;;  %v1571_v10 = vld [vmem:[#allocation5 + $0x28] sm:$0xf0]  ;;  %v312_v16 = vld [vmem:[%s2385_s8 + $0x80] sm:$0xff]  ;;  %v2579_v48 = vpack.c.bf16 %v351_v5, %v349_v2 }
  0x58   : > { %1816 = vmatpush.bf16.msra.mxu3 %v1618_v63  ;;  %686 = vmatpush.bf16.msra.mxu1 %v1618_v63  ;;  %v2527_v62 = vpack.c.bf16 %v310_v59, %v308_v58  ;;  %v2529_v63 = vpack.c.bf16 %v342_v61, %v340_v60  ;;  %1406 = vst [vmem:[%s2407_s24 + $0x1b0] sm:$0xff] %v351_v5  ;;  %v1635_v14 = vld [vmem:[#allocation5 + $0xa8] sm:$0xf0]  ;;  %v314_v17 = vld [vmem:[%s2385_s8 + $0x90] sm:$0xff]  ;;  %v344_v18 = vld [vmem:[%s2385_s8 + $0x180] sm:$0xff] }
  0x59   : > { %1372 = vst [vmem:[%s2407_s24 + $0xa0] sm:$0xff] %v317_v6  ;;  %v1638_v15 = vor.u32 %v1771_v13, %v1635_v14  ;;  %v346_v19 = vld [vmem:[%s2385_s8 + $0x190] sm:$0xff]  ;;  %v353_v24 = vld [vmem:[%s2385_s8 + $0x1c8] sm:$0xff]  ;;  %v355_v25 = vld [vmem:[%s2385_s8 + $0x1d8] sm:$0xff] }
  0x5a   : > { %598 = vmatmul.bf16.vlgmr.msra.gmra.mxu0 %v2447_v3  ;;  %638 = vmatmul.bf16.vlgmr.msra.gmra.mxu2 %v2449_v4  ;;  %1408 = vst [vmem:[%s2407_s24 + $0x1c0] sm:$0xff] %v353_v24  ;;  %v323_v33 = vld [vmem:[%s2385_s8 + $0xd8] sm:$0xff]  ;;  %v316_v38 = vld [vmem:[%s2385_s8 + $0xa0] sm:$0xff]  ;;  %v350_v41 = vld [vmem:[%s2385_s8 + $0x1b0] sm:$0xff]  ;;  %v2603_v13 = vpack.c.bf16 %v355_v25, %v353_v24 }
  0x5b   : > { %768 = vmatpush.bf16.msrb.mxu2 %v1614_v0  ;;  %727 = vmatmul.bf16.vlgmr.msra.gmra.mxu3 %v2453_v8  ;;  %v2531_v0 = vpack.c.bf16 %v343_v31, %v341_v30  ;;  %1410 = vst [vmem:[%s2407_s24 + $0x1d0] sm:$0xff] %v355_v25  ;;  %v321_v30 = vld [vmem:[%s2385_s8 + $0xc8] sm:$0xff]  ;;  %v1753_v31 = vld [vmem:[#allocation5 + $0x14] sm:$0xf]  ;;  %v348_v40 = vld [vmem:[%s2385_s8 + $0x1a0] sm:$0xff] }
  0x5c   : > { %857 = vmatpush.bf16.msrb.mxu3 %v1678_v1  ;;  %687 = vmatmul.bf16.vlgmr.msra.gmra.mxu1 %v2457_v9  ;;  %v2533_v1 = vpack.c.bf16 %v311_v35, %v309_v32  ;;  %v1563_v32 = vld [vmem:[#allocation5 + $0x18] sm:$0xf0]  ;;  %1376 = vst [vmem:[%s2407_s24 + $0xc0] sm:$0xff] %v321_v30  ;;  %v1769_v35 = vld [vmem:[#allocation5 + $0x94] sm:$0xf]  ;;  %v2577_v43 = vpack.c.bf16 %v350_v41, %v348_v40  ;;  %v357_v50 = vld [vmem:[%s2385_s8 + $0x1e8] sm:$0xff] }
  0x5d   : > { %v1566_v34 = vor.u32 %v1753_v31, %v1563_v32  ;;  %1378 = vst [vmem:[%s2407_s24 + $0xd0] sm:$0xff] %v323_v33  ;;  %v359_v51 = vld [vmem:[%s2385_s8 + $0x1f8] sm:$0xff]  ;;  %v325_v52 = vld [vmem:[%s2385_s8 + $0xe8] sm:$0xff]  ;;  %v1767_v58 = vld [vmem:[#allocation5 + $0x84] sm:$0xf]  ;;  %v2605_v14 = vpack.c.bf16 %v323_v33, %v321_v30 }
  0x5e   : > { %1412 = vst [vmem:[%s2407_s24 + $0x1e0] sm:$0xff] %v357_v50  ;;  %v327_v53 = vld [vmem:[%s2385_s8 + $0xf8] sm:$0xff]  ;;  %v1555_v55 = vld [vmem:[#allocation5 + $0x8] sm:$0xf0]  ;;  %v320_v5 = vld [vmem:[%s2385_s8 + $0xc0] sm:$0xff]  ;;  %v2619_v33 = vpack.c.bf16 %v359_v51, %v357_v50 }
  0x5f   : > { %769 = vmatpush.bf16.msrb.mxu2 %v1606_v11  ;;  %v319_v11 = vld [vmem:[%s2385_s8 + $0xb8] sm:$0xff]  ;;  %1414 = vst [vmem:[%s2407_s24 + $0x1f0] sm:$0xff] %v359_v51  ;;  %v1619_v59 = vld [vmem:[#allocation5 + $0x88] sm:$0xf0]  ;;  %v356_v31 = vld [vmem:[%s2385_s8 + $0x1e0] sm:$0xff] }
  0x60   : > { %858 = vmatpush.bf16.msrb.mxu3 %v1670_v12  ;;  %v1574_v12 = vor.u32 %v1755_v7, %v1571_v10  ;;  %1374 = vst [vmem:[%s2407_s24 + $0xb0] sm:$0xff] %v319_v11  ;;  %v2581_v49 = vpack.c.bf16 %v319_v11, %v317_v6  ;;  %v1790_v56 = vld [vmem:[#allocation8 + $0x38] sm:$0xff]  ;;  %v1622_v60 = vor.u32 %v1767_v58, %v1619_v59  ;;  %v1789_v61 = vld [vmem:[#allocation8 + $0x30] sm:$0xff]  ;;  %v1788_v2 = vld [vmem:[#allocation8 + $0x28] sm:$0xff] }
  0x61   : > { %1380 = vst [vmem:[%s2407_s24 + $0xe0] sm:$0xff] %v325_v52  ;;  %1174 = vmatpush.bf16.msrb.mxu0 %v1790_v56  ;;  %v322_v6 = vld [vmem:[%s2385_s8 + $0xd0] sm:$0xff]  ;;  %v352_v7 = vld [vmem:[%s2385_s8 + $0x1c0] sm:$0xff] }
  0x62   : > { %1382 = vst [vmem:[%s2407_s24 + $0xf0] sm:$0xff] %v327_v53  ;;  %v354_v10 = vld [vmem:[%s2385_s8 + $0x1d0] sm:$0xff]  ;;  %v2599_v11 = vpack.c.bf16 %v322_v6, %v320_v5 }
  0x63   : > { %770 = vmatpush.bf16.msrb.mxu2 %v1598_v20  ;;  %v2551_v20 = vpack.c.bf16 %v314_v17, %v312_v16  ;;  %v1786_v16 = vld [vmem:[#allocation8 + $0x18] sm:$0xff]  ;;  %v1785_v17 = vld [vmem:[#allocation8 + $0x10] sm:$0xff]  ;;  %v1784_v25 = vld [vmem:[#allocation8 + $0x8] sm:$0xff] }
  0x64   : > { %859 = vmatpush.bf16.msrb.mxu3 %v1662_v21  ;;  %v2553_v21 = vpack.c.bf16 %v346_v19, %v344_v18  ;;  %v324_v18 = vld [vmem:[%s2385_s8 + $0xe0] sm:$0xff]  ;;  %v326_v19 = vld [vmem:[%s2385_s8 + $0xf0] sm:$0xff] }
  0x65   : > { %1175 = vmatpush.bf16.msrb.mxu0 %v1789_v61  ;;  %v358_v24 = vld [vmem:[%s2385_s8 + $0x1f0] sm:$0xff]  ;;  %v2615_v30 = vpack.c.bf16 %v326_v19, %v324_v18 }
  0x66   : > { %v2617_v32 = vpack.c.bf16 %v358_v24, %v356_v31  ;;  %v1797_v59 = vld [vmem:[#allocation8 + $0x70] sm:$0xff] }
  0x67   : > { %771 = vmatpush.bf16.msrb.mxu2 %v1590_v36  ;;  %v1627_v36 = vld [vmem:[#allocation5 + $0x98] sm:$0xf0] }
  0x68   : > { %860 = vmatpush.bf16.msrb.mxu3 %v1654_v39  ;;  %v1630_v37 = vor.u32 %v1769_v35, %v1627_v36  ;;  %v318_v39 = vld [vmem:[%s2385_s8 + $0xb0] sm:$0xff]  ;;  %v1783_v35 = vld [vmem:[#allocation8] sm:$0xff]  ;;  %v1798_v36 = vld [vmem:[#allocation8 + $0x78] sm:$0xff] }
  0x69   : > { %v2575_v42 = vpack.c.bf16 %v318_v39, %v316_v38  ;;  %1176 = vmatpush.bf16.msrb.mxu0 %v1788_v2  ;;  %1263 = vmatpush.bf16.msrb.mxu1 %v1798_v36 }
  0x6a   : > { %603 = vmatmul.bf16.gmra.mxu0 %v2475_v26  ;;  %643 = vmatmul.bf16.gmra.mxu2 %v2477_v27 }
  0x6b   : > { %732 = vmatmul.bf16.gmra.mxu3 %v2481_v28  ;;  %772 = vmatpush.bf16.msrb.mxu2 %v1582_v54  ;;  %v1751_v54 = vld [vmem:[#allocation5 + $0x4] sm:$0xf] }
  0x6c   : > { %692 = vmatmul.bf16.gmra.mxu1 %v2485_v29  ;;  %861 = vmatpush.bf16.msrb.mxu3 %v1646_v57  ;;  %v1558_v57 = vor.u32 %v1751_v54, %v1555_v55 }
  0x6d   : > { %1264 = vmatpush.bf16.msrb.mxu1 %v1797_v59 }
  0x6f   : > { %773 = vmatpush.bf16.msrb.mxu2 %v1574_v12  ;;  %v2601_v12 = vpack.c.bf16 %v354_v10, %v352_v7 }
  0x70   : > { %862 = vmatpush.bf16.msrb.mxu3 %v1638_v15  ;;  %v1787_v15 = vld [vmem:[#allocation8 + $0x20] sm:$0xff] }
  0x71   : > { %1177 = vmatpush.bf16.msrb.mxu0 %v1787_v15 }
  0x73   : > { %774 = vmatpush.bf16.msrb.mxu2 %v1566_v34  ;;  %v2621_v34 = vpack.c.bf16 %v327_v53, %v325_v52 }
  0x74   : > { %863 = vmatpush.bf16.msrb.mxu3 %v1630_v37  ;;  %v2627_v37 = vld [vmem:[#allocation7] sm:$0x3] }
  0x75   : > { %1178 = vmatpush.bf16.msrb.mxu0 %v1786_v16  ;;  %v2630_v39 = vperm.slane %v2627_v37, 0 }
  0x77   : > { %775 = vmatpush.bf16.msrb.mxu2 %v1558_v57 }
  0x78   : > { %864 = vmatpush.bf16.msrb.mxu3 %v1622_v60 }
  0x79   : > { %1179 = vmatpush.bf16.msrb.mxu0 %v1785_v17 }
  0x7a   : > { %608 = vmatmul.bf16.gmra.mxu0 %v2503_v44  ;;  %648 = vmatmul.bf16.gmra.mxu2 %v2505_v45 }
  0x7b   : > { %737 = vmatmul.bf16.gmra.mxu3 %v2507_v46 }
  0x7c   : > { %697 = vmatmul.bf16.gmra.mxu1 %v2509_v47 }
  0x7d   : > { %1180 = vmatpush.bf16.msrb.mxu0 %v1784_v25 }
  0x81   : > { %1181 = vmatpush.bf16.msrb.mxu0 %v1783_v35 }
  0x8a   : > { %613 = vmatmul.bf16.gmra.mxu0 %v2527_v62  ;;  %653 = vmatmul.bf16.gmra.mxu2 %v2529_v63 }
  0x8b   : > { %742 = vmatmul.bf16.gmra.mxu3 %v2531_v0 }
  0x8c   : > { %702 = vmatmul.bf16.gmra.mxu1 %v2533_v1 }
  0x9a   : > { %618 = vmatmul.bf16.gmra.mxu0 %v2551_v20  ;;  %658 = vmatmul.bf16.gmra.mxu2 %v2553_v21 }
  0x9b   : > { %747 = vmatmul.bf16.gmra.mxu3 %v2555_v22 }
  0x9c   : > { %707 = vmatmul.bf16.gmra.mxu1 %v2557_v23 }
  0xaa   : > { %623 = vmatmul.bf16.gmra.mxu0 %v2575_v42  ;;  %663 = vmatmul.bf16.gmra.mxu2 %v2577_v43 }
  0xab   : > { %752 = vmatmul.bf16.gmra.mxu3 %v2579_v48 }
  0xac   : > { %712 = vmatmul.bf16.gmra.mxu1 %v2581_v49 }
  0xba   : > { %628 = vmatmul.bf16.gmra.mxu0 %v2599_v11  ;;  %668 = vmatmul.bf16.gmra.mxu2 %v2601_v12 }
  0xbb   : > { %757 = vmatmul.bf16.gmra.mxu3 %v2603_v13 }
  0xbc   : > { %717 = vmatmul.bf16.gmra.mxu1 %v2605_v14 }
  0xca   : > { %633 = vmatmul.bf16.gmra.mxu0 %v2615_v30  ;;  %673 = vmatmul.bf16.gmra.mxu2 %v2617_v32 }
  0xcb   : > { %762 = vmatmul.bf16.gmra.mxu3 %v2619_v33 }
  0xcc   : > { %722 = vmatmul.bf16.gmra.mxu1 %v2621_v34 }
  0xd7   : > { %v599_v38 = vpop.f32.mrf.mxu0 }
  0xd8   : > { %v600_v41 = vadd.f32 %v599_v38, %v2630_v39 }
  0xd9   : > { %v688_v40 = vpop.f32.mrf.mxu1 }
  0xda   : > { %776 = vmatmul.bf16.vlgmr.msrb.gmra.mxu2 %v2447_v3  ;;  %v689_v51 = vadd.f32 %v688_v40, %v600_v41  ;;  %v1796_v40 = vld [vmem:[#allocation8 + $0x68] sm:$0xff] }
  0xdb   : > { %865 = vmatmul.bf16.vlgmr.msrb.gmra.mxu3 %v2457_v9  ;;  %1265 = vmatpush.bf16.msrb.mxu1 %v1796_v40 }
  0xdc   : > { %1903 = vtanh.f32 %v689_v51 }
  0xdd   : > { %v639_v50 = vpop.f32.mrf.mxu2 }
  0xde   : > { %v640_v52 = vadd.f32 %v639_v50, %v2630_v39  ;;  %v728_v53 = vpop.f32.mrf.mxu3 }
  0xdf   : > { %v601_v54 = vpop.f32.mrf.mxu0 }
  0xe0   : > { %v729_v55 = vadd.f32 %v728_v53, %v640_v52  ;;  %v602_v56 = vadd.f32 %v601_v54, %v2630_v39 }
  0xe1   : > { %v690_v57 = vpop.f32.mrf.mxu1 }
  0xe2   : > { %v691_v58 = vadd.f32 %v690_v57, %v602_v56  ;;  %v1904_v2 = vpop.eup %1903 }
  0xe4   : > { %1905 = vtanh.f32 %v691_v58 }
  0xe5   : > { %v641_v60 = vpop.f32.mrf.mxu2  ;;  %1907 = vtanh.f32 %v729_v55 }
  0xe6   : > { %v642_v61 = vadd.f32 %v641_v60, %v2630_v39  ;;  %v730_v3 = vpop.f32.mrf.mxu3 }
  0xe7   : > { %v604_v9 = vpop.f32.mrf.mxu0 }
  0xe8   : > { %v731_v5 = vadd.f32 %v730_v3, %v642_v61  ;;  %v605_v10 = vadd.f32 %v604_v9, %v2630_v39 }
  0xe9   : > { %v693_v6 = vpop.f32.mrf.mxu1 }
  0xea   : > { %v1906_v7 = vpop.eup %1905  ;;  %1909 = vtanh.f32 %v731_v5  ;;  %781 = vmatmul.bf16.gmra.mxu2 %v2475_v26  ;;  %v694_v17 = vadd.f32 %v693_v6, %v605_v10 }
  0xeb   : > { %870 = vmatmul.bf16.gmra.mxu3 %v2485_v29  ;;  %v1010_v15 = vpack.c.bf16 %v1906_v7, %v1904_v2  ;;  %v2642_v31 = vpop.eup %1907 }
  0xec   : > { %1911 = vtanh.f32 %v694_v17 }
  0xed   : > { %v644_v16 = vpop.f32.mrf.mxu2  ;;  %1182 = vmatmul.bf16.vlgmr.msrb.gmra.mxu0 %v1010_v15  ;;  %v1795_v15 = vld [vmem:[#allocation8 + $0x60] sm:$0xff] }
  0xee   : > { %v645_v18 = vadd.f32 %v644_v16, %v2630_v39  ;;  %v733_v19 = vpop.f32.mrf.mxu3  ;;  %1266 = vmatpush.bf16.msrb.mxu1 %v1795_v15 }
  0xef   : > { %v606_v24 = vpop.f32.mrf.mxu0 }
  0xf0   : > { %v2644_v25 = vpop.eup %1909  ;;  %v734_v35 = vadd.f32 %v733_v19, %v645_v18  ;;  %v607_v36 = vadd.f32 %v606_v24, %v2630_v39 }
  0xf1   : > { %v695_v38 = vpop.f32.mrf.mxu1  ;;  %v1026_v26 = vpack.c.bf16 %v2644_v25, %v2642_v31 }
  0xf2   : > { %v696_v29 = vadd.f32 %v695_v38, %v607_v36  ;;  %v1912_v53 = vpop.eup %1911 }
  0xf4   : > { %1913 = vtanh.f32 %v696_v29 }
  0xf5   : > { %v646_v41 = vpop.f32.mrf.mxu2  ;;  %1915 = vtanh.f32 %v734_v35 }
  0xf6   : > { %v647_v50 = vadd.f32 %v646_v41, %v2630_v39  ;;  %v735_v51 = vpop.f32.mrf.mxu3 }
  0xf7   : > { %v609_v52 = vpop.f32.mrf.mxu0 }
  0xf8   : > { %v736_v54 = vadd.f32 %v735_v51, %v647_v50  ;;  %v610_v57 = vadd.f32 %v609_v52, %v2630_v39 }
  0xf9   : > { %v698_v55 = vpop.f32.mrf.mxu1 }
  0xfa   : > { %v1914_v56 = vpop.eup %1913  ;;  %1917 = vtanh.f32 %v736_v54  ;;  %786 = vmatmul.bf16.gmra.mxu2 %v2503_v44  ;;  %v699_v60 = vadd.f32 %v698_v55, %v610_v57 }
  0xfb   : > { %875 = vmatmul.bf16.gmra.mxu3 %v2509_v47  ;;  %v1012_v58 = vpack.c.bf16 %v1914_v56, %v1912_v53  ;;  %v2654_v9 = vpop.eup %1915 }
  0xfc   : > { %1919 = vtanh.f32 %v699_v60 }
  0xfd   : > { %v649_v59 = vpop.f32.mrf.mxu2  ;;  %1187 = vmatmul.bf16.gmra.mxu0 %v1012_v58 }
  0xfe   : > { %v650_v61 = vadd.f32 %v649_v59, %v2630_v39  ;;  %v738_v3 = vpop.f32.mrf.mxu3  ;;  %v1794_v59 = vld [vmem:[#allocation8 + $0x58] sm:$0xff] }
  0xff   : > { %v611_v2 = vpop.f32.mrf.mxu0  ;;  %1267 = vmatpush.bf16.msrb.mxu1 %v1794_v59 }
 0x100   : > { %v2656_v5 = vpop.eup %1917  ;;  %v739_v6 = vadd.f32 %v738_v3, %v650_v61  ;;  %v612_v7 = vadd.f32 %v611_v2, %v2630_v39 }
 0x101   : > { %v700_v10 = vpop.f32.mrf.mxu1  ;;  %v1028_v44 = vpack.c.bf16 %v2656_v5, %v2654_v9 }
 0x102   : > { %v701_v47 = vadd.f32 %v700_v10, %v612_v7  ;;  %v1920_v24 = vpop.eup %1919 }
 0x104   : > { %1921 = vtanh.f32 %v701_v47 }
 0x105   : > { %v651_v16 = vpop.f32.mrf.mxu2  ;;  %1923 = vtanh.f32 %v739_v6 }
 0x106   : > { %v652_v17 = vadd.f32 %v651_v16, %v2630_v39  ;;  %v740_v18 = vpop.f32.mrf.mxu3 }
 0x107   : > { %v614_v19 = vpop.f32.mrf.mxu0 }
 0x108   : > { %v741_v35 = vadd.f32 %v740_v18, %v652_v17  ;;  %v615_v29 = vadd.f32 %v614_v19, %v2630_v39 }
 0x109   : > { %v703_v36 = vpop.f32.mrf.mxu1 }
 0x10a   : > { %v1922_v38 = vpop.eup %1921  ;;  %1925 = vtanh.f32 %v741_v35  ;;  %791 = vmatmul.bf16.gmra.mxu2 %v2527_v62  ;;  %v704_v50 = vadd.f32 %v703_v36, %v615_v29 }
 0x10b   : > { %880 = vmatmul.bf16.gmra.mxu3 %v2533_v1  ;;  %v1014_v40 = vpack.c.bf16 %v1922_v38, %v1920_v24  ;;  %v2666_v53 = vpop.eup %1923 }
 0x10c   : > { %1927 = vtanh.f32 %v704_v50  ;;  %v1793_v50 = vld [vmem:[#allocation8 + $0x50] sm:$0xff] }
 0x10d   : > { %v654_v41 = vpop.f32.mrf.mxu2  ;;  %1192 = vmatmul.bf16.gmra.mxu0 %v1014_v40  ;;  %1268 = vmatpush.bf16.msrb.mxu1 %v1793_v50 }
 0x10e   : > { %v655_v51 = vadd.f32 %v654_v41, %v2630_v39  ;;  %v743_v52 = vpop.f32.mrf.mxu3 }
 0x10f   : > { %v616_v54 = vpop.f32.mrf.mxu0 }
 0x110   : > { %v2668_v55 = vpop.eup %1925  ;;  %v744_v56 = vadd.f32 %v743_v52, %v655_v51  ;;  %v617_v57 = vadd.f32 %v616_v54, %v2630_v39 }
 0x111   : > { %v705_v58 = vpop.f32.mrf.mxu1  ;;  %v1030_v62 = vpack.c.bf16 %v2668_v55, %v2666_v53 }
 0x112   : > { %v706_v1 = vadd.f32 %v705_v58, %v617_v57  ;;  %v1928_v6 = vpop.eup %1927 }
 0x114   : > { %1929 = vtanh.f32 %v706_v1 }
 0x115   : > { %v656_v60 = vpop.f32.mrf.mxu2  ;;  %1931 = vtanh.f32 %v744_v56 }
 0x116   : > { %v657_v61 = vadd.f32 %v656_v60, %v2630_v39  ;;  %v745_v3 = vpop.f32.mrf.mxu3 }
 0x117   : > { %v619_v2 = vpop.f32.mrf.mxu0 }
 0x118   : > { %v746_v7 = vadd.f32 %v745_v3, %v657_v61  ;;  %v620_v15 = vadd.f32 %v619_v2, %v2630_v39 }
 0x119   : > { %v708_v10 = vpop.f32.mrf.mxu1 }
 0x11a   : > { %v1930_v47 = vpop.eup %1929  ;;  %1933 = vtanh.f32 %v746_v7  ;;  %796 = vmatmul.bf16.gmra.mxu2 %v2551_v20  ;;  %v709_v18 = vadd.f32 %v708_v10, %v620_v15 }
 0x11b   : > { %885 = vmatmul.bf16.gmra.mxu3 %v2557_v23  ;;  %v1016_v16 = vpack.c.bf16 %v1930_v47, %v1928_v6  ;;  %v2678_v35 = vpop.eup %1931 }
 0x11c   : > { %1935 = vtanh.f32 %v709_v18 }
 0x11d   : > { %v659_v17 = vpop.f32.mrf.mxu2  ;;  %1197 = vmatmul.bf16.gmra.mxu0 %v1016_v16 }
 0x11e   : > { %v660_v19 = vadd.f32 %v659_v17, %v2630_v39  ;;  %v748_v24 = vpop.f32.mrf.mxu3 }
 0x11f   : > { %v621_v36 = vpop.f32.mrf.mxu0 }
 0x120   : > { %v2680_v38 = vpop.eup %1933  ;;  %v749_v29 = vadd.f32 %v748_v24, %v660_v19  ;;  %v622_v40 = vadd.f32 %v621_v36, %v2630_v39  ;;  %v1792_v19 = vld [vmem:[#allocation8 + $0x48] sm:$0xff] }
 0x121   : > { %v710_v41 = vpop.f32.mrf.mxu1  ;;  %v1032_v20 = vpack.c.bf16 %v2680_v38, %v2678_v35  ;;  %1269 = vmatpush.bf16.msrb.mxu1 %v1792_v19 }
 0x122   : > { %v711_v23 = vadd.f32 %v710_v41, %v622_v40  ;;  %v1936_v57 = vpop.eup %1935 }
 0x124   : > { %1937 = vtanh.f32 %v711_v23 }
 0x125   : > { %v661_v51 = vpop.f32.mrf.mxu2  ;;  %1939 = vtanh.f32 %v749_v29 }
 0x126   : > { %v662_v52 = vadd.f32 %v661_v51, %v2630_v39  ;;  %v750_v54 = vpop.f32.mrf.mxu3 }
 0x127   : > { %v624_v56 = vpop.f32.mrf.mxu0 }
 0x128   : > { %v751_v58 = vadd.f32 %v750_v54, %v662_v52  ;;  %v625_v60 = vadd.f32 %v624_v56, %v2630_v39 }
 0x129   : > { %v713_v1 = vpop.f32.mrf.mxu1 }
 0x12a   : > { %v1938_v59 = vpop.eup %1937  ;;  %1941 = vtanh.f32 %v751_v58  ;;  %801 = vmatmul.bf16.gmra.mxu2 %v2575_v42  ;;  %v714_v2 = vadd.f32 %v713_v1, %v625_v60 }
 0x12b   : > { %890 = vmatmul.bf16.gmra.mxu3 %v2581_v49  ;;  %v1018_v61 = vpack.c.bf16 %v1938_v59, %v1936_v57  ;;  %v2690_v10 = vpop.eup %1939 }
 0x12c   : > { %1943 = vtanh.f32 %v714_v2 }
 0x12d   : > { %v664_v3 = vpop.f32.mrf.mxu2  ;;  %1202 = vmatmul.bf16.gmra.mxu0 %v1018_v61 }
 0x12e   : > { %v665_v6 = vadd.f32 %v664_v3, %v2630_v39  ;;  %v753_v7 = vpop.f32.mrf.mxu3 }
 0x12f   : > { %v626_v47 = vpop.f32.mrf.mxu0 }
 0x130   : > { %v2692_v15 = vpop.eup %1941  ;;  %v754_v16 = vadd.f32 %v753_v7, %v665_v6  ;;  %v627_v17 = vadd.f32 %v626_v47, %v2630_v39  ;;  %v1791_v7 = vld [vmem:[#allocation8 + $0x40] sm:$0xff] }
 0x131   : > { %v715_v18 = vpop.f32.mrf.mxu1  ;;  %v1034_v42 = vpack.c.bf16 %v2692_v15, %v2690_v10  ;;  %1270 = vmatpush.bf16.msrb.mxu1 %v1791_v7 }
 0x132   : > { %v716_v49 = vadd.f32 %v715_v18, %v627_v17  ;;  %v1944_v41 = vpop.eup %1943 }
 0x134   : > { %1945 = vtanh.f32 %v716_v49 }
 0x135   : > { %v666_v24 = vpop.f32.mrf.mxu2  ;;  %1947 = vtanh.f32 %v754_v16 }
 0x136   : > { %v667_v36 = vadd.f32 %v666_v24, %v2630_v39  ;;  %v755_v29 = vpop.f32.mrf.mxu3 }
 0x137   : > { %v629_v40 = vpop.f32.mrf.mxu0 }
 0x138   : > { %v756_v23 = vadd.f32 %v755_v29, %v667_v36  ;;  %v630_v52 = vadd.f32 %v629_v40, %v2630_v39 }
 0x139   : > { %v718_v50 = vpop.f32.mrf.mxu1 }
 0x13a   : > { %v1946_v51 = vpop.eup %1945  ;;  %1949 = vtanh.f32 %v756_v23  ;;  %806 = vmatmul.bf16.gmra.mxu2 %v2599_v11  ;;  %v719_v57 = vadd.f32 %v718_v50, %v630_v52 }
 0x13b   : > { %895 = vmatmul.bf16.gmra.mxu3 %v2605_v14  ;;  %v1020_v54 = vpack.c.bf16 %v1946_v51, %v1944_v41  ;;  %v2702_v59 = vpop.eup %1947 }
 0x13c   : > { %1951 = vtanh.f32 %v719_v57 }
 0x13d   : > { %v669_v56 = vpop.f32.mrf.mxu2  ;;  %1207 = vmatmul.bf16.gmra.mxu0 %v1020_v54 }
 0x13e   : > { %v670_v58 = vadd.f32 %v669_v56, %v2630_v39  ;;  %v758_v1 = vpop.f32.mrf.mxu3 }
 0x13f   : > { %v631_v60 = vpop.f32.mrf.mxu0 }
 0x140   : > { %v2704_v61 = vpop.eup %1949  ;;  %v759_v3 = vadd.f32 %v758_v1, %v670_v58  ;;  %v632_v2 = vadd.f32 %v631_v60, %v2630_v39 }
 0x141   : > { %v720_v6 = vpop.f32.mrf.mxu1  ;;  %v1036_v11 = vpack.c.bf16 %v2704_v61, %v2702_v59 }
 0x142   : > { %v721_v14 = vadd.f32 %v720_v6, %v632_v2  ;;  %v1952_v49 = vpop.eup %1951 }
 0x144   : > { %1953 = vtanh.f32 %v721_v14 }
 0x145   : > { %v671_v47 = vpop.f32.mrf.mxu2  ;;  %1955 = vtanh.f32 %v759_v3 }
 0x146   : > { %v672_v16 = vadd.f32 %v671_v47, %v2630_v39  ;;  %v760_v17 = vpop.f32.mrf.mxu3 }
 0x147   : > { %v634_v18 = vpop.f32.mrf.mxu0 }
 0x148   : > { %v761_v19 = vadd.f32 %v760_v17, %v672_v16  ;;  %v635_v29 = vadd.f32 %v634_v18, %v2630_v39  ;;  %v2725_v16 = vperm.slane %v2627_v37, 1 }
 0x149   : > { %v723_v24 = vpop.f32.mrf.mxu1 }
 0x14a   : > { %v1954_v36 = vpop.eup %1953  ;;  %1957 = vtanh.f32 %v761_v19  ;;  %811 = vmatmul.bf16.gmra.mxu2 %v2615_v30  ;;  %v724_v23 = vadd.f32 %v723_v24, %v635_v29 }
 0x14b   : > { %900 = vmatmul.bf16.gmra.mxu3 %v2621_v34  ;;  %v1022_v40 = vpack.c.bf16 %v1954_v36, %v1952_v49  ;;  %v2714_v52 = vpop.eup %1955 }
 0x14c   : > { %1959 = vtanh.f32 %v724_v23 }
 0x14d   : > { %v674_v41 = vpop.f32.mrf.mxu2  ;;  %1212 = vmatmul.bf16.gmra.mxu0 %v1022_v40 }
 0x14e   : > { %v675_v50 = vadd.f32 %v674_v41, %v2630_v39  ;;  %v763_v51 = vpop.f32.mrf.mxu3 }
 0x14f   : > { %v636_v54 = vpop.f32.mrf.mxu0 }
 0x150   : > { %v2716_v56 = vpop.eup %1957  ;;  %v764_v57 = vadd.f32 %v763_v51, %v675_v50  ;;  %v637_v58 = vadd.f32 %v636_v54, %v2630_v39 }
 0x151   : > { %v725_v1 = vpop.f32.mrf.mxu1  ;;  %v1038_v30 = vpack.c.bf16 %v2716_v56, %v2714_v52 }
 0x152   : > { %v726_v34 = vadd.f32 %v725_v1, %v637_v58  ;;  %v1960_v6 = vpop.eup %1959 }
 0x154   : > { %1961 = vtanh.f32 %v726_v34 }
 0x155   : > { %v676_v60 = vpop.f32.mrf.mxu2  ;;  %1963 = vtanh.f32 %v764_v57 }
 0x156   : > { %v677_v3 = vadd.f32 %v676_v60, %v2630_v39  ;;  %v765_v2 = vpop.f32.mrf.mxu3 }
 0x158   : > { %v766_v14 = vadd.f32 %v765_v2, %v677_v3 }
 0x15a   : > { %v1962_v7 = vpop.eup %1961  ;;  %1965 = vtanh.f32 %v766_v14  ;;  %816 = vmatmul.bf16.gmra.mxu2 %v2449_v4 }
 0x15b   : > { %905 = vmatmul.bf16.gmra.mxu3 %v2453_v8  ;;  %v1024_v47 = vpack.c.bf16 %v1962_v7, %v1960_v6  ;;  %v2727_v49 = vpop.eup %1963 }
 0x15d   : > { %v777_v17 = vpop.f32.mrf.mxu2  ;;  %1217 = vmatmul.bf16.gmra.mxu0 %v1024_v47 }
 0x15e   : > { %v866_v18 = vpop.f32.mrf.mxu3  ;;  %v778_v19 = vadd.f32 %v777_v17, %v2725_v16 }
 0x160   : > { %v2729_v39 = vpop.eup %1965  ;;  %v867_v36 = vadd.f32 %v866_v18, %v778_v19 }
 0x161   : > { %v1040_v24 = vpack.c.bf16 %v2729_v39, %v2727_v49  ;;  %v2808_v49 = vld [vmem:[%s2946_s4] ss:$0 sm:$0xff] }
 0x162   : > { %1967 = vtanh.f32 %v867_v36 }
 0x165   : > { %v779_v4 = vpop.f32.mrf.mxu2 }
 0x166   : > { %v780_v8 = vadd.f32 %v779_v4, %v2725_v16  ;;  %v868_v29 = vpop.f32.mrf.mxu3 }
 0x168   : > { %v869_v40 = vadd.f32 %v868_v29, %v780_v8  ;;  %v1968_v23 = vpop.eup %1967 }
 0x16a   : > { %1969 = vtanh.f32 %v869_v40  ;;  %821 = vmatmul.bf16.gmra.mxu2 %v2477_v27 }
 0x16b   : > { %910 = vmatmul.bf16.gmra.mxu3 %v2481_v28 }
 0x16d   : > { %v782_v37 = vpop.f32.mrf.mxu2  ;;  %1222 = vmatmul.bf16.gmra.mxu0 %v1026_v26 }
 0x16e   : > { %v871_v41 = vpop.f32.mrf.mxu3  ;;  %v783_v51 = vadd.f32 %v782_v37, %v2725_v16 }
 0x170   : > { %v1970_v50 = vpop.eup %1969  ;;  %v872_v57 = vadd.f32 %v871_v41, %v783_v51 }
 0x171   : > { %v1011_v54 = vpack.c.bf16 %v1970_v50, %v1968_v23 }
 0x172   : > { %1971 = vtanh.f32 %v872_v57 }
 0x173   : > { %1271 = vmatmul.bf16.vlgmr.msrb.gmra.mxu1 %v1011_v54 }
 0x175   : > { %v784_v58 = vpop.f32.mrf.mxu2 }
 0x176   : > { %v785_v1 = vadd.f32 %v784_v58, %v2725_v16  ;;  %v873_v34 = vpop.f32.mrf.mxu3 }
 0x178   : > { %v874_v27 = vadd.f32 %v873_v34, %v785_v1  ;;  %v1972_v25 = vpop.eup %1971 }
 0x17a   : > { %1973 = vtanh.f32 %v874_v27  ;;  %826 = vmatmul.bf16.gmra.mxu2 %v2505_v45 }
 0x17b   : > { %915 = vmatmul.bf16.gmra.mxu3 %v2507_v46 }
 0x17d   : > { %v787_v28 = vpop.f32.mrf.mxu2  ;;  %1227 = vmatmul.bf16.gmra.mxu0 %v1028_v44 }
 0x17e   : > { %v876_v31 = vpop.f32.mrf.mxu3  ;;  %v788_v60 = vadd.f32 %v787_v28, %v2725_v16 }
 0x180   : > { %v1974_v26 = vpop.eup %1973  ;;  %v877_v2 = vadd.f32 %v876_v31, %v788_v60 }
 0x181   : > { %v1013_v3 = vpack.c.bf16 %v1974_v26, %v1972_v25 }
 0x182   : > { %1975 = vtanh.f32 %v877_v2 }
 0x183   : > { %1276 = vmatmul.bf16.gmra.mxu1 %v1013_v3 }
 0x185   : > { %v789_v6 = vpop.f32.mrf.mxu2 }
 0x186   : > { %v790_v14 = vadd.f32 %v789_v6, %v2725_v16  ;;  %v878_v7 = vpop.f32.mrf.mxu3 }
 0x188   : > { %v879_v45 = vadd.f32 %v878_v7, %v790_v14  ;;  %v1976_v5 = vpop.eup %1975 }
 0x18a   : > { %1977 = vtanh.f32 %v879_v45  ;;  %831 = vmatmul.bf16.gmra.mxu2 %v2529_v63  ;;  %v2756_v63 = vpop.f32.mrf.mxu0 }
 0x18b   : > { %920 = vmatmul.bf16.gmra.mxu3 %v2531_v0 }
 0x18d   : > { %v792_v46 = vpop.f32.mrf.mxu2  ;;  %1232 = vmatmul.bf16.gmra.mxu0 %v1030_v62 }
 0x18e   : > { %v881_v9 = vpop.f32.mrf.mxu3  ;;  %v793_v47 = vadd.f32 %v792_v46, %v2725_v16 }
 0x190   : > { %v1978_v44 = vpop.eup %1977  ;;  %v882_v18 = vadd.f32 %v881_v9, %v793_v47 }
 0x191   : > { %v1015_v17 = vpack.c.bf16 %v1978_v44, %v1976_v5 }
 0x192   : > { %1979 = vtanh.f32 %v882_v18  ;;  %v2763_v29 = vpop.f32.mrf.mxu0 }
 0x193   : > { %1281 = vmatmul.bf16.gmra.mxu1 %v1015_v17 }
 0x195   : > { %v794_v19 = vpop.f32.mrf.mxu2 }
 0x196   : > { %v795_v36 = vadd.f32 %v794_v19, %v2725_v16  ;;  %v883_v4 = vpop.f32.mrf.mxu3 }
 0x198   : > { %v884_v0 = vadd.f32 %v883_v4, %v795_v36  ;;  %v1980_v62 = vpop.eup %1979 }
 0x19a   : > { %1981 = vtanh.f32 %v884_v0  ;;  %836 = vmatmul.bf16.gmra.mxu2 %v2553_v21  ;;  %v2768_v35 = vpop.f32.mrf.mxu0 }
 0x19b   : > { %925 = vmatmul.bf16.gmra.mxu3 %v2555_v22 }
 0x19d   : > { %v797_v53 = vpop.f32.mrf.mxu2  ;;  %1237 = vmatmul.bf16.gmra.mxu0 %v1032_v20 }
 0x19e   : > { %v886_v55 = vpop.f32.mrf.mxu3  ;;  %v798_v40 = vadd.f32 %v797_v53, %v2725_v16 }
 0x1a0   : > { %v1982_v8 = vpop.eup %1981  ;;  %v887_v41 = vadd.f32 %v886_v55, %v798_v40  ;;  %v1184_v40 = vadd.f32 %v2808_v49, %v2756_v63 }
 0x1a1   : > { %v1017_v37 = vpack.c.bf16 %v1982_v8, %v1980_v62 }
 0x1a2   : > { %1983 = vtanh.f32 %v887_v41  ;;  %v2775_v1 = vpop.f32.mrf.mxu0 }
 0x1a3   : > { %1286 = vmatmul.bf16.gmra.mxu1 %v1017_v37 }
 0x1a5   : > { %v799_v23 = vpop.f32.mrf.mxu2 }
 0x1a6   : > { %v800_v21 = vadd.f32 %v799_v23, %v2725_v16  ;;  %v888_v50 = vpop.f32.mrf.mxu3 }
 0x1a8   : > { %v889_v22 = vadd.f32 %v888_v50, %v800_v21  ;;  %v1984_v51 = vpop.eup %1983 }
 0x1aa   : > { %1985 = vtanh.f32 %v889_v22  ;;  %841 = vmatmul.bf16.gmra.mxu2 %v2577_v43  ;;  %v2783_v31 = vpop.f32.mrf.mxu0 }
 0x1ab   : > { %930 = vmatmul.bf16.gmra.mxu3 %v2579_v48 }
 0x1ad   : > { %v802_v38 = vpop.f32.mrf.mxu2  ;;  %1242 = vmatmul.bf16.gmra.mxu0 %v1034_v42 }
 0x1ae   : > { %v891_v20 = vpop.f32.mrf.mxu3  ;;  %v803_v57 = vadd.f32 %v802_v38, %v2725_v16 }
 0x1b0   : > { %v1986_v54 = vpop.eup %1985  ;;  %v892_v34 = vadd.f32 %v891_v20, %v803_v57 }
 0x1b1   : > { %v1019_v58 = vpack.c.bf16 %v1986_v54, %v1984_v51  ;;  %v1186_v54 = vadd.f32 %v2808_v49, %v2763_v29 }
 0x1b2   : > { %1987 = vtanh.f32 %v892_v34  ;;  %v2787_v14 = vpop.f32.mrf.mxu0 }
 0x1b3   : > { %1291 = vmatmul.bf16.gmra.mxu1 %v1019_v58 }
 0x1b5   : > { %v804_v43 = vpop.f32.mrf.mxu2 }
 0x1b6   : > { %v805_v27 = vadd.f32 %v804_v43, %v2725_v16  ;;  %v893_v28 = vpop.f32.mrf.mxu3 }
 0x1b8   : > { %v894_v48 = vadd.f32 %v893_v28, %v805_v27  ;;  %v1988_v42 = vpop.eup %1987 }
 0x1ba   : > { %1989 = vtanh.f32 %v894_v48  ;;  %846 = vmatmul.bf16.gmra.mxu2 %v2601_v12  ;;  %v2795_v9 = vpop.f32.mrf.mxu0  ;;  %v1189_v48 = vadd.f32 %v2808_v49, %v2768_v35 }
 0x1bb   : > { %935 = vmatmul.bf16.gmra.mxu3 %v2603_v13 }
 0x1bd   : > { %v807_v10 = vpop.f32.mrf.mxu2  ;;  %1247 = vmatmul.bf16.gmra.mxu0 %v1036_v11 }
 0x1be   : > { %v896_v15 = vpop.f32.mrf.mxu3  ;;  %v808_v26 = vadd.f32 %v807_v10, %v2725_v16 }
 0x1c0   : > { %v1990_v25 = vpop.eup %1989  ;;  %v897_v3 = vadd.f32 %v896_v15, %v808_v26 }
 0x1c1   : > { %v1021_v60 = vpack.c.bf16 %v1990_v25, %v1988_v42 }
 0x1c2   : > { %1991 = vtanh.f32 %v897_v3  ;;  %v2798_v17 = vpop.f32.mrf.mxu0 }
 0x1c3   : > { %1296 = vmatmul.bf16.gmra.mxu1 %v1021_v60 }
 0x1c5   : > { %v809_v2 = vpop.f32.mrf.mxu2 }
 0x1c6   : > { %v810_v12 = vadd.f32 %v809_v2, %v2725_v16  ;;  %v898_v6 = vpop.f32.mrf.mxu3 }
 0x1c8   : > { %v899_v13 = vadd.f32 %v898_v6, %v810_v12  ;;  %v1992_v11 = vpop.eup %1991  ;;  %v1191_v12 = vadd.f32 %v2808_v49, %v2775_v1 }
 0x1ca   : > { %1993 = vtanh.f32 %v899_v13  ;;  %851 = vmatmul.bf16.gmra.mxu2 %v2617_v32  ;;  %v2818_v43 = vpop.f32.mrf.mxu0 }
 0x1cb   : > { %940 = vmatmul.bf16.gmra.mxu3 %v2619_v33 }
 0x1cd   : > { %v812_v59 = vpop.f32.mrf.mxu2  ;;  %1252 = vmatmul.bf16.gmra.mxu0 %v1038_v30 }
 0x1ce   : > { %v901_v61 = vpop.f32.mrf.mxu3  ;;  %v813_v45 = vadd.f32 %v812_v59, %v2725_v16 }
 0x1d0   : > { %v1994_v7 = vpop.eup %1993  ;;  %v902_v5 = vadd.f32 %v901_v61, %v813_v45  ;;  %v1194_v45 = vadd.f32 %v2808_v49, %v2783_v31 }
 0x1d1   : > { %v1023_v46 = vpack.c.bf16 %v1994_v7, %v1992_v11 }
 0x1d2   : > { %1995 = vtanh.f32 %v902_v5  ;;  %v2827_v6 = vpop.f32.mrf.mxu0 }
 0x1d3   : > { %1301 = vmatmul.bf16.gmra.mxu1 %v1023_v46 }
 0x1d5   : > { %v814_v44 = vpop.f32.mrf.mxu2 }
 0x1d6   : > { %v815_v32 = vadd.f32 %v814_v44, %v2725_v16  ;;  %v903_v47 = vpop.f32.mrf.mxu3 }
 0x1d8   : > { %v904_v33 = vadd.f32 %v903_v47, %v815_v32  ;;  %v1996_v30 = vpop.eup %1995 }
 0x1da   : > { %1997 = vtanh.f32 %v904_v33  ;;  %v2833_v47 = vpop.f32.mrf.mxu0 }
 0x1dd   : > { %v817_v52 = vpop.f32.mrf.mxu2  ;;  %1257 = vmatmul.bf16.gmra.mxu0 %v1040_v24 }
 0x1de   : > { %v906_v56 = vpop.f32.mrf.mxu3  ;;  %v818_v19 = vadd.f32 %v817_v52, %v2725_v16 }
 0x1e0   : > { %v1998_v18 = vpop.eup %1997  ;;  %v907_v4 = vadd.f32 %v906_v56, %v818_v19 }
 0x1e1   : > { %v1025_v36 = vpack.c.bf16 %v1998_v18, %v1996_v30  ;;  %v1196_v18 = vadd.f32 %v2808_v49, %v2787_v14 }
 0x1e2   : > { %1999 = vtanh.f32 %v907_v4  ;;  %v2840_v4 = vpop.f32.mrf.mxu0 }
 0x1e3   : > { %1306 = vmatmul.bf16.gmra.mxu1 %v1025_v36 }
 0x1e5   : > { %v819_v0 = vpop.f32.mrf.mxu2 }
 0x1e6   : > { %v820_v53 = vadd.f32 %v819_v0, %v2725_v16  ;;  %v908_v55 = vpop.f32.mrf.mxu3 }
 0x1e8   : > { %v909_v62 = vadd.f32 %v908_v55, %v820_v53  ;;  %v2000_v8 = vpop.eup %1999 }
 0x1ea   : > { %2001 = vtanh.f32 %v909_v62  ;;  %v1199_v62 = vadd.f32 %v2808_v49, %v2795_v9 }
 0x1ed   : > { %v822_v39 = vpop.f32.mrf.mxu2 }
 0x1ee   : > { %v911_v24 = vpop.f32.mrf.mxu3  ;;  %v823_v23 = vadd.f32 %v822_v39, %v2725_v16 }
 0x1f0   : > { %v2002_v37 = vpop.eup %2001  ;;  %v1272_v41 = vpop.f32.mrf.mxu1  ;;  %v912_v22 = vadd.f32 %v911_v24, %v823_v23 }
 0x1f1   : > { %v1273_v21 = vadd.f32 %v1272_v41, %v1184_v40  ;;  %v1027_v50 = vpack.c.bf16 %v2002_v37, %v2000_v8  ;;  %v1213_v23 = vpop.f32.mrf.mxu0 }
 0x1f2   : > { %2003 = vtanh.f32 %v912_v22  ;;  %v1201_v22 = vadd.f32 %v2808_v49, %v2798_v17 }
 0x1f3   : > { %1353 = vst [vmem:[%s2407_s24 + $0x8] sm:$0xff] %v1273_v21  ;;  %1311 = vmatmul.bf16.gmra.mxu1 %v1027_v50 }
 0x1f5   : > { %v824_v38 = vpop.f32.mrf.mxu2 }
 0x1f6   : > { %v825_v20 = vadd.f32 %v824_v38, %v2725_v16  ;;  %v913_v51 = vpop.f32.mrf.mxu3 }
 0x1f8   : > { %v914_v57 = vadd.f32 %v913_v51, %v825_v20  ;;  %v1274_v63 = vpop.f32.mrf.mxu1  ;;  %v2004_v28 = vpop.eup %2003 }
 0x1f9   : > { %v1275_v58 = vadd.f32 %v1274_v63, %v1186_v54  ;;  %v1204_v63 = vadd.f32 %v2808_v49, %v2818_v43 }
 0x1fa   : > { %2005 = vtanh.f32 %v914_v57 }
 0x1fb   : > { %1355 = vst [vmem:[%s2407_s24 + $0x18] sm:$0xff] %v1275_v58 }
 0x1fd   : > { %v827_v34 = vpop.f32.mrf.mxu2 }
 0x1fe   : > { %v916_v27 = vpop.f32.mrf.mxu3  ;;  %v828_v42 = vadd.f32 %v827_v34, %v2725_v16  ;;  %v1215_v34 = vpop.f32.mrf.mxu0 }
 0x200   : > { %v2006_v10 = vpop.eup %2005  ;;  %v1277_v15 = vpop.f32.mrf.mxu1  ;;  %v917_v26 = vadd.f32 %v916_v27, %v828_v42 }
 0x201   : > { %v1278_v29 = vadd.f32 %v1277_v15, %v1189_v48  ;;  %v1029_v25 = vpack.c.bf16 %v2006_v10, %v2004_v28 }
 0x202   : > { %2007 = vtanh.f32 %v917_v26 }
 0x203   : > { %1357 = vst [vmem:[%s2407_s24 + $0x28] sm:$0xff] %v1278_v29  ;;  %1316 = vmatmul.bf16.gmra.mxu1 %v1029_v25  ;;  %v1206_v25 = vadd.f32 %v2808_v49, %v2827_v6 }
 0x205   : > { %v829_v60 = vpop.f32.mrf.mxu2 }
 0x206   : > { %v830_v3 = vadd.f32 %v829_v60, %v2725_v16  ;;  %v918_v2 = vpop.f32.mrf.mxu3 }
 0x208   : > { %v919_v35 = vadd.f32 %v918_v2, %v830_v3  ;;  %v1279_v13 = vpop.f32.mrf.mxu1  ;;  %v2008_v7 = vpop.eup %2007 }
 0x209   : > { %v1280_v59 = vadd.f32 %v1279_v13, %v1191_v12  ;;  %v1218_v3 = vpop.f32.mrf.mxu0  ;;  %v1209_v13 = vadd.f32 %v2808_v49, %v2833_v47 }
 0x20a   : > { %2009 = vtanh.f32 %v919_v35 }
 0x20b   : > { %1359 = vst [vmem:[%s2407_s24 + $0x38] sm:$0xff] %v1280_v59 }
 0x20d   : > { %v832_v61 = vpop.f32.mrf.mxu2 }
 0x20e   : > { %v921_v11 = vpop.f32.mrf.mxu3  ;;  %v833_v44 = vadd.f32 %v832_v61, %v2725_v16 }
 0x210   : > { %v2010_v46 = vpop.eup %2009  ;;  %v1282_v5 = vpop.f32.mrf.mxu1  ;;  %v922_v33 = vadd.f32 %v921_v11, %v833_v44 }
 0x211   : > { %v1283_v1 = vadd.f32 %v1282_v5, %v1194_v45  ;;  %v1031_v32 = vpack.c.bf16 %v2010_v46, %v2008_v7  ;;  %v1220_v45 = vpop.f32.mrf.mxu0 }
 0x212   : > { %2011 = vtanh.f32 %v922_v33 }
 0x213   : > { %1361 = vst [vmem:[%s2407_s24 + $0x48] sm:$0xff] %v1283_v1  ;;  %1321 = vmatmul.bf16.gmra.mxu1 %v1031_v32  ;;  %v1211_v32 = vadd.f32 %v2808_v49, %v2840_v4 }
 0x215   : > { %v834_v52 = vpop.f32.mrf.mxu2 }
 0x216   : > { %v835_v56 = vadd.f32 %v834_v52, %v2725_v16  ;;  %v923_v30 = vpop.f32.mrf.mxu3 }
 0x218   : > { %v924_v31 = vadd.f32 %v923_v30, %v835_v56  ;;  %v1284_v19 = vpop.f32.mrf.mxu1  ;;  %v2012_v55 = vpop.eup %2011 }
 0x219   : > { %v1285_v36 = vadd.f32 %v1284_v19, %v1196_v18  ;;  %v1223_v30 = vpop.f32.mrf.mxu0  ;;  %v1214_v19 = vadd.f32 %v2808_v49, %v1213_v23 }
 0x21a   : > { %2013 = vtanh.f32 %v924_v31 }
 0x21b   : > { %1363 = vst [vmem:[%s2407_s24 + $0x58] sm:$0xff] %v1285_v36 }
 0x21d   : > { %v837_v0 = vpop.f32.mrf.mxu2 }
 0x21e   : > { %v926_v53 = vpop.f32.mrf.mxu3  ;;  %v838_v8 = vadd.f32 %v837_v0, %v2725_v16 }
 0x220   : > { %v2014_v39 = vpop.eup %2013  ;;  %v1287_v24 = vpop.f32.mrf.mxu1  ;;  %v927_v37 = vadd.f32 %v926_v53, %v838_v8  ;;  %v1216_v8 = vadd.f32 %v2808_v49, %v1215_v34 }
 0x221   : > { %v1288_v14 = vadd.f32 %v1287_v24, %v1199_v62  ;;  %v1033_v40 = vpack.c.bf16 %v2014_v39, %v2012_v55 }
 0x222   : > { %2015 = vtanh.f32 %v927_v37 }
 0x223   : > { %1365 = vst [vmem:[%s2407_s24 + $0x68] sm:$0xff] %v1288_v14  ;;  %1326 = vmatmul.bf16.gmra.mxu1 %v1033_v40  ;;  %v1225_v40 = vpop.f32.mrf.mxu0 }
 0x225   : > { %v839_v41 = vpop.f32.mrf.mxu2 }
 0x226   : > { %v840_v21 = vadd.f32 %v839_v41, %v2725_v16  ;;  %v928_v50 = vpop.f32.mrf.mxu3 }
 0x228   : > { %v929_v38 = vadd.f32 %v928_v50, %v840_v21  ;;  %v1289_v9 = vpop.f32.mrf.mxu1  ;;  %v2016_v57 = vpop.eup %2015  ;;  %v1219_v50 = vadd.f32 %v2808_v49, %v1218_v3 }
 0x229   : > { %v1290_v20 = vadd.f32 %v1289_v9, %v1201_v22 }
 0x22a   : > { %2017 = vtanh.f32 %v929_v38 }
 0x22b   : > { %1367 = vst [vmem:[%s2407_s24 + $0x78] sm:$0xff] %v1290_v20  ;;  %v1228_v20 = vpop.f32.mrf.mxu0 }
 0x22d   : > { %v842_v51 = vpop.f32.mrf.mxu2 }
 0x22e   : > { %v931_v54 = vpop.f32.mrf.mxu3  ;;  %v843_v28 = vadd.f32 %v842_v51, %v2725_v16  ;;  %v1221_v51 = vadd.f32 %v2808_v49, %v1220_v45 }
 0x230   : > { %v2018_v58 = vpop.eup %2017  ;;  %v1292_v27 = vpop.f32.mrf.mxu1  ;;  %v932_v10 = vadd.f32 %v931_v54, %v843_v28 }
 0x231   : > { %v1293_v17 = vadd.f32 %v1292_v27, %v1204_v63  ;;  %v1035_v48 = vpack.c.bf16 %v2018_v58, %v2016_v57  ;;  %v1224_v58 = vadd.f32 %v2808_v49, %v1223_v30 }
 0x232   : > { %2019 = vtanh.f32 %v932_v10 }
 0x233   : > { %1369 = vst [vmem:[%s2407_s24 + $0x88] sm:$0xff] %v1293_v17  ;;  %1331 = vmatmul.bf16.gmra.mxu1 %v1035_v48  ;;  %v1230_v63 = vpop.f32.mrf.mxu0  ;;  %v1226_v17 = vadd.f32 %v2808_v49, %v1225_v40 }
 0x235   : > { %v844_v15 = vpop.f32.mrf.mxu2 }
 0x236   : > { %v845_v42 = vadd.f32 %v844_v15, %v2725_v16  ;;  %v933_v29 = vpop.f32.mrf.mxu3  ;;  %v1229_v15 = vadd.f32 %v2808_v49, %v1228_v20 }
 0x238   : > { %v934_v26 = vadd.f32 %v933_v29, %v845_v42  ;;  %v1294_v43 = vpop.f32.mrf.mxu1  ;;  %v2020_v35 = vpop.eup %2019 }
 0x239   : > { %v1295_v60 = vadd.f32 %v1294_v43, %v1206_v25 }
 0x23a   : > { %2021 = vtanh.f32 %v934_v26  ;;  %v1231_v26 = vadd.f32 %v2808_v49, %v1230_v63 }
 0x23b   : > { %1371 = vst [vmem:[%s2407_s24 + $0x98] sm:$0xff] %v1295_v60  ;;  %v1233_v28 = vpop.f32.mrf.mxu0 }
 0x23d   : > { %v847_v2 = vpop.f32.mrf.mxu2 }
 0x23e   : > { %v936_v12 = vpop.f32.mrf.mxu3  ;;  %v848_v11 = vadd.f32 %v847_v2, %v2725_v16  ;;  %v1234_v2 = vadd.f32 %v2808_v49, %v1233_v28 }
 0x240   : > { %v2022_v59 = vpop.eup %2021  ;;  %v1297_v61 = vpop.f32.mrf.mxu1  ;;  %v937_v46 = vadd.f32 %v936_v12, %v848_v11 }
 0x241   : > { %v1298_v6 = vadd.f32 %v1297_v61, %v1209_v13  ;;  %v1037_v7 = vpack.c.bf16 %v2022_v59, %v2020_v35 }
 0x242   : > { %2023 = vtanh.f32 %v937_v46 }
 0x243   : > { %1373 = vst [vmem:[%s2407_s24 + $0xa8] sm:$0xff] %v1298_v6  ;;  %1336 = vmatmul.bf16.gmra.mxu1 %v1037_v7  ;;  %v1235_v42 = vpop.f32.mrf.mxu0 }
 0x244   : > { %v1236_v59 = vadd.f32 %v2808_v49, %v1235_v42 }
 0x245   : > { %v849_v5 = vpop.f32.mrf.mxu2 }
 0x246   : > { %v850_v44 = vadd.f32 %v849_v5, %v2725_v16  ;;  %v938_v1 = vpop.f32.mrf.mxu3 }
 0x248   : > { %v939_v33 = vadd.f32 %v938_v1, %v850_v44  ;;  %v1299_v47 = vpop.f32.mrf.mxu1  ;;  %v2024_v31 = vpop.eup %2023 }
 0x249   : > { %v1300_v52 = vadd.f32 %v1299_v47, %v1211_v32 }
 0x24a   : > { %2025 = vtanh.f32 %v939_v33 }
 0x24b   : > { %1375 = vst [vmem:[%s2407_s24 + $0xb8] sm:$0xff] %v1300_v52  ;;  %v1238_v3 = vpop.f32.mrf.mxu0 }
 0x24c   : > { %v1239_v7 = vadd.f32 %v2808_v49, %v1238_v3 }
 0x24d   : > { %v852_v56 = vpop.f32.mrf.mxu2 }
 0x24e   : > { %v941_v18 = vpop.f32.mrf.mxu3  ;;  %v853_v53 = vadd.f32 %v852_v56, %v2725_v16 }
 0x250   : > { %v2026_v36 = vpop.eup %2025  ;;  %v1302_v0 = vpop.f32.mrf.mxu1  ;;  %v942_v62 = vadd.f32 %v941_v18, %v853_v53 }
 0x251   : > { %v1303_v55 = vadd.f32 %v1302_v0, %v1214_v19  ;;  %v1039_v4 = vpack.c.bf16 %v2026_v36, %v2024_v31 }
 0x252   : > { %2027 = vtanh.f32 %v942_v62 }
 0x253   : > { %1377 = vst [vmem:[%s2407_s24 + $0xc8] sm:$0xff] %v1303_v55  ;;  %1341 = vmatmul.bf16.gmra.mxu1 %v1039_v4  ;;  %v1240_v13 = vpop.f32.mrf.mxu0 }
 0x254   : > { %v1241_v5 = vadd.f32 %v2808_v49, %v1240_v13 }
 0x255   : > { %v854_v39 = vpop.f32.mrf.mxu2 }
 0x256   : > { %v855_v24 = vadd.f32 %v854_v39, %v2725_v16  ;;  %v943_v14 = vpop.f32.mrf.mxu3 }
 0x258   : > { %v944_v37 = vadd.f32 %v943_v14, %v855_v24  ;;  %v1304_v41 = vpop.f32.mrf.mxu1  ;;  %v2028_v21 = vpop.eup %2027 }
 0x259   : > { %v1305_v23 = vadd.f32 %v1304_v41, %v1216_v8 }
 0x25a   : > { %2029 = vtanh.f32 %v944_v37 }
 0x25b   : > { %1379 = vst [vmem:[%s2407_s24 + $0xd8] sm:$0xff] %v1305_v23  ;;  %v1243_v6 = vpop.f32.mrf.mxu0 }
 0x25c   : > { %v1244_v33 = vadd.f32 %v2808_v49, %v1243_v6 }
 0x260   : > { %v2030_v22 = vpop.eup %2029  ;;  %v1307_v38 = vpop.f32.mrf.mxu1 }
 0x261   : > { %v1308_v9 = vadd.f32 %v1307_v38, %v1219_v50  ;;  %v1041_v16 = vpack.c.bf16 %v2030_v22, %v2028_v21 }
 0x263   : > { %1381 = vst [vmem:[%s2407_s24 + $0xe8] sm:$0xff] %v1308_v9  ;;  %1346 = vmatmul.bf16.gmra.mxu1 %v1041_v16  ;;  %v1245_v44 = vpop.f32.mrf.mxu0 }
 0x264   : > { %v1246_v30 = vadd.f32 %v2808_v49, %v1245_v44 }
 0x268   : > { %v1309_v54 = vpop.f32.mrf.mxu1 }
 0x269   : > { %v1310_v57 = vadd.f32 %v1309_v54, %v1221_v51 }
 0x26b   : > { %1383 = vst [vmem:[%s2407_s24 + $0xf8] sm:$0xff] %v1310_v57  ;;  %v1248_v56 = vpop.f32.mrf.mxu0 }
 0x26c   : > { %v1249_v36 = vadd.f32 %v2808_v49, %v1248_v56 }
 0x270   : > { %v1312_v34 = vpop.f32.mrf.mxu1 }
 0x271   : > { %v1313_v27 = vadd.f32 %v1312_v34, %v1224_v58 }
 0x273   : > { %1385 = vst [vmem:[%s2407_s24 + $0x108] sm:$0xff] %v1313_v27  ;;  %v1250_v19 = vpop.f32.mrf.mxu0 }
 0x274   : > { %v1251_v4 = vadd.f32 %v2808_v49, %v1250_v19 }
 0x278   : > { %v1314_v48 = vpop.f32.mrf.mxu1 }
 0x279   : > { %v1315_v10 = vadd.f32 %v1314_v48, %v1226_v17 }
 0x27b   : > { %1387 = vst [vmem:[%s2407_s24 + $0x118] sm:$0xff] %v1315_v10  ;;  %v1253_v55 = vpop.f32.mrf.mxu0 }
 0x27c   : > { %v1254_v24 = vadd.f32 %v2808_v49, %v1253_v55 }
 0x280   : > { %v1317_v29 = vpop.f32.mrf.mxu1 }
 0x281   : > { %v1318_v25 = vadd.f32 %v1317_v29, %v1229_v15 }
 0x283   : > { %1389 = vst [vmem:[%s2407_s24 + $0x128] sm:$0xff] %v1318_v25  ;;  %v1255_v8 = vpop.f32.mrf.mxu0 }
 0x284   : > { %v1256_v37 = vadd.f32 %v2808_v49, %v1255_v8 }
 0x288   : > { %v1319_v43 = vpop.f32.mrf.mxu1 }
 0x289   : > { %v1320_v60 = vadd.f32 %v1319_v43, %v1231_v26 }
 0x28b   : > { %1391 = vst [vmem:[%s2407_s24 + $0x138] sm:$0xff] %v1320_v60  ;;  %v1258_v21 = vpop.f32.mrf.mxu0 }
 0x28c   : > { %v1259_v50 = vadd.f32 %v2808_v49, %v1258_v21 }
 0x290   : > { %v1322_v12 = vpop.f32.mrf.mxu1 }
 0x291   : > { %v1323_v35 = vadd.f32 %v1322_v12, %v1234_v2 }
 0x293   : > { %1393 = vst [vmem:[%s2407_s24 + $0x148] sm:$0xff] %v1323_v35  ;;  %v1260_v9 = vpop.f32.mrf.mxu0 }
 0x294   : > { %v1261_v16 = vadd.f32 %v2808_v49, %v1260_v9 }
 0x298   : > { %v1324_v61 = vpop.f32.mrf.mxu1 }
 0x299   : > { %v1325_v11 = vadd.f32 %v1324_v61, %v1236_v59 }
 0x29b   : > { %1395 = vst [vmem:[%s2407_s24 + $0x158] sm:$0xff] %v1325_v11 }
 0x2a0   : > { %v1327_v45 = vpop.f32.mrf.mxu1 }
 0x2a1   : > { %v1328_v46 = vadd.f32 %v1327_v45, %v1239_v7 }
 0x2a3   : > { %1397 = vst [vmem:[%s2407_s24 + $0x168] sm:$0xff] %v1328_v46 }
 0x2a8   : > { %v1329_v1 = vpop.f32.mrf.mxu1 }
 0x2a9   : > { %v1330_v32 = vadd.f32 %v1329_v1, %v1241_v5 }
 0x2ab   : > { %1399 = vst [vmem:[%s2407_s24 + $0x178] sm:$0xff] %v1330_v32 }
 0x2b0   : > { %v1332_v47 = vpop.f32.mrf.mxu1 }
 0x2b1   : > { %v1333_v52 = vadd.f32 %v1332_v47, %v1244_v33 }
 0x2b3   : > { %1401 = vst [vmem:[%s2407_s24 + $0x188] sm:$0xff] %v1333_v52 }
 0x2b8   : > { %v1334_v18 = vpop.f32.mrf.mxu1 }
 0x2b9   : > { %v1335_v31 = vadd.f32 %v1334_v18, %v1246_v30 }
 0x2bb   : > { %1403 = vst [vmem:[%s2407_s24 + $0x198] sm:$0xff] %v1335_v31 }
 0x2c0   : > { %v1337_v0 = vpop.f32.mrf.mxu1 }
 0x2c1   : > { %v1338_v53 = vadd.f32 %v1337_v0, %v1249_v36 }
 0x2c3   : > { %1405 = vst [vmem:[%s2407_s24 + $0x1a8] sm:$0xff] %v1338_v53 }
 0x2c8   : > { %v1339_v62 = vpop.f32.mrf.mxu1 }
 0x2c9   : > { %v1340_v39 = vadd.f32 %v1339_v62, %v1251_v4 }
 0x2cb   : > { %1407 = vst [vmem:[%s2407_s24 + $0x1b8] sm:$0xff] %v1340_v39 }
 0x2d0   : > { %v1342_v14 = vpop.f32.mrf.mxu1 }
 0x2d1   : > { %v1343_v40 = vadd.f32 %v1342_v14, %v1254_v24 }
 0x2d3   : > { %1409 = vst [vmem:[%s2407_s24 + $0x1c8] sm:$0xff] %v1343_v40 }
 0x2d8   : > { %v1344_v41 = vpop.f32.mrf.mxu1 }
 0x2d9   : > { %v1345_v23 = vadd.f32 %v1344_v41, %v1256_v37 }
 0x2db   : > { %1411 = vst [vmem:[%s2407_s24 + $0x1d8] sm:$0xff] %v1345_v23 }
 0x2e0   : > { %v1347_v22 = vpop.f32.mrf.mxu1 }
 0x2e1   : > { %v1348_v38 = vadd.f32 %v1347_v22, %v1259_v50 }
 0x2e3   : > { %1413 = vst [vmem:[%s2407_s24 + $0x1e8] sm:$0xff] %v1348_v38 }
 0x2e8   : > { %v1349_v20 = vpop.f32.mrf.mxu1 }
 0x2e9   : > { %v1350_v51 = vadd.f32 %v1349_v20, %v1261_v16 }
 0x2eb   : > { %1415 = vst [vmem:[%s2407_s24 + $0x1f8] sm:$0xff] %v1350_v51 }
 0x2ec   : > { %2178 = shalt.err (!%p2175_p10)
}
 0x2ed   : > { %s2236_s17 = smov 256   ;;  %s2237_s24 = smov 16  }
 0x2ee   : > { %1831 = dma.vmem_to_hbm [thread:$0]  (%p2351_p7), %s1431_s12, 8192, %s1433_s13, %s1417_s14, %s2236_s17, %s2236_s17, %s2237_s24  }
 0x2ef PF: > { %s1447_s16 = sand.u32 1, %s2213_s18   ;;  %p2954_p12 = scmp.ge.s32.totalorder %s2225_s21, 2 }
 0x2f0   : > { %s1448_s23 = scalar_lea.sflag [#allocation4], %s1447_s16 }
 0x2f1   : > { %p1848_p13 = pnand %p2954_p12, %p2303_p6 }
 0x2f3   : > { %p1849_p0 = pneg %p1848_p13 }
 0x2f5   : > { %2208 = dma.done.wait (%p1849_p0), %s1448_s23, 8192  }
 0x2f6   : > { %2210 = vsyncadd (%p1849_p0), %s1448_s23, 4294959104  ;;  %p20_p3 = scmp.ge.s32.totalorder %s2337_s30, 4   ;;  %s2955_s18 = smov %s2217_s19 }
 0x2f7   : > { %s2956_s19 = smov %s2221_s20  ;;  %s2957_s20 = smov %s2347_s9 }
 0x2f8   : > { %s2958_s21 = smov %s2337_s30  ;;  %22 = sbr.rel (!%p20_p3) target bundleno = 7 (0x7), region = 97 }
 0x2fd   :  { %1454 = vsyncpa [#allocation3], 1 }
 0x2fe   :  { %1456 = vsyncpa [#allocation3 + $0x1], 1 }
 0x2ff   :  { %1457 = vsyncpa [#allocation6], 1 }
 0x300   :  { %1458 = vsyncpa [#allocation9], 1 }
 0x301   :  { %1459 = vsyncpa [#allocation4], 1 }
 0x302   :  { %1461 = vsyncpa [#allocation4 + $0x1], 1 }

</bundles_post_ra>
